<compile_context>
chip_gen: v7x
topology: tpu7x:2x2x1
jax: 0.10.0
libtpu: 0.0.40
codegen_flags: <defaults>
</compile_context>

<pallas_src>
import jax
import jax.numpy as jnp
from jax.experimental import pallas as pl
from jax.experimental.pallas import tpu as pltpu

_SMALL_BYTES = 1 << 20           # below this, plain fused XLA wins (launch/ramp overhead)
_TARGET_TILE_BYTES = 4 << 20     # ~4 MiB tiles: >= 85% of HBM roofline for any dtype
_VMEM_LIMIT_BYTES = 32 << 20     # 2 in + 2 out buffers (16 MiB) fit on v5e/v6e/v7x


def _neg_scale_kernel(coeff_ref, g_ref, o_ref):
    # grad_input = -coeff * grad_output (multiply in f32, single cast on store).
    scale = -coeff_ref[0]                                  # f32 scalar from SMEM
    o_ref[...] = (g_ref[...] * scale).astype(o_ref.dtype)


def _neg_scale(g, coeff):
    """Compute -coeff * g. Pallas for large lane-friendly grads, fused XLA otherwise."""
    total = int(g.size)
    if total == 0:
        return g
    itemsize = g.dtype.itemsize

    # Fast path: tiny grads (per-step + launch overhead dominates) and truly
    # ragged totals (a pallas_call would force padded copies). XLA's fused
    # elementwise is already at the HBM roofline and fuses with neighbours.
    if total * itemsize < _SMALL_BYTES or total % 128 != 0:
        return (g * (-coeff)).astype(g.dtype)

    # Widest lane width (multiple of 128) dividing the element count -> every
    # store is a full unmasked vst, and the reshape below is a free bitcast.
    lane = next(l for l in (1024, 512, 256, 128) if total % l == 0)
    rows = total // lane

    # Bytes-based tile sizing, capped so there are always >= 2 tiles (both v7x
    # TensorCores get work). Block sublane dim must be a multiple of 8; a
    # partial edge tile is handled by masked writes, not by padding the array.
    target_rows = max(8, _TARGET_TILE_BYTES // (lane * itemsize))
    half_rows = -(-rows // 2)
    tile_rows = max(8, (min(target_rows, half_rows) // 8) * 8)
    n_tiles = -(-rows // tile_rows)

    g2 = g.reshape(rows, lane)                # contiguous reshape: zero-copy
    coeff_smem = jnp.asarray(coeff, dtype=jnp.float32).reshape(1)

    out = pl.pallas_call(
        _neg_scale_kernel,
        out_shape=jax.ShapeDtypeStruct((rows, lane), g.dtype),
        grid=(n_tiles,),
        in_specs=[
            # coeff lives in SMEM (runtime scalar -> no recompile as it ramps)
            pl.BlockSpec(memory_space=pltpu.MemorySpace.SMEM),
            pl.BlockSpec((tile_rows, lane), lambda i: (i, 0)),
        ],
        out_specs=pl.BlockSpec((tile_rows, lane), lambda i: (i, 0)),
        input_output_aliases={1: 0},          # donate the grad buffer
        cost_estimate=pl.CostEstimate(
            flops=total,
            transcendentals=0,
            bytes_accessed=2 * total * itemsize),
        compiler_params=pltpu.CompilerParams(
            dimension_semantics=("parallel",),
            vmem_limit_bytes=_VMEM_LIMIT_BYTES),
    )(coeff_smem, g2)

    return out.reshape(g.shape)


@jax.custom_vjp
def _grl(x, coeff):
    # Forward of GradientReverseLayer is a pure identity (output = input * 1.0).
    # No kernel: launching one would only pay a full HBM read + write.
    del coeff
    return x


def _grl_fwd(x, coeff):
    return x, coeff


def _grl_bwd(coeff, g):
    # coeff gets a zero cotangent (PyTorch returns None for it).
    return _neg_scale(g, coeff), jnp.zeros_like(coeff)


_grl.defvjp(_grl_fwd, _grl_bwd)


def gradient_reverse_layer(x, coeff=1.0):
    """GradientReverseLayer: identity forward, grad_input = -coeff * grad_output."""
    coeff = jnp.asarray(coeff, dtype=jnp.float32)
    return _grl(x, coeff)


if __name__ == "__main__":
    key = jax.random.PRNGKey(0)
    # Small NCHW-style input, consistent with a conv-feature discriminator input.
    x = jax.random.normal(key, (2, 4, 16, 16), dtype=jnp.float32)

    # Forward: must be an exact identity.
    y = jax.block_until_ready(gradient_reverse_layer(x, 1.0))
    assert y.shape == x.shape and y.dtype == x.dtype
    assert jnp.array_equal(y, x)

    # Backward, small grad (fast path): grad = -coeff * upstream.
    coeff = 0.5
    upstream = jax.random.normal(jax.random.PRNGKey(1), x.shape, dtype=jnp.float32)
    grad_x = jax.block_until_ready(
        jax.grad(lambda a: jnp.sum(gradient_reverse_layer(a, coeff) * upstream))(x))
    assert jnp.allclose(grad_x, -coeff * upstream, atol=1e-6)

    # Ragged shape (total % 128 != 0): fused-XLA path, no padded copies.
    x_r = jax.random.normal(jax.random.PRNGKey(2), (2, 3, 17, 19), dtype=jnp.float32)
    g_r = jax.block_until_ready(
        jax.grad(lambda a: jnp.sum(gradient_reverse_layer(a, 1.5)))(x_r))
    assert jnp.allclose(g_r, -1.5 * jnp.ones_like(x_r), atol=1e-6)

    # Larger fp32 grad: multi-tile Pallas path (grid >= 2, both v7x TCs busy).
    x_b = jax.random.normal(jax.random.PRNGKey(3), (8, 8, 128, 128), dtype=jnp.float32)
    g_b = jax.block_until_ready(
        jax.grad(lambda a: jnp.sum(gradient_reverse_layer(a, 2.0)))(x_b))
    assert jnp.allclose(g_b, -2.0 * jnp.ones_like(x_b), atol=1e-6)

    # bf16 grad with a row count that does not divide the tile: exercises
    # dtype-aware tile sizing and the masked edge tile (no padding pass).
    x_h = jax.random.normal(jax.random.PRNGKey(4), (7, 200, 1024), dtype=jnp.bfloat16)
    g_h = jax.block_until_ready(
        jax.grad(lambda a: jnp.sum(gradient_reverse_layer(a, 2.0).astype(jnp.float32)))(x_h))
    assert g_h.dtype == jnp.bfloat16
    assert jnp.allclose(g_h.astype(jnp.float32), -2.0 * jnp.ones(x_h.shape, jnp.float32))

    print("KERNEL_OK")
</pallas_src>

<mosaic_0001>
module attributes {stable_mosaic.version = 11 : i64} {
  func.func @_neg_scale_kernel(%arg0: i32, %arg1: memref<1xf32, #tpu.memory_space<smem>>, %arg2: memref<512x1024xf32, #tpu.memory_space<vmem>>, %arg3: memref<512x1024xf32, #tpu.memory_space<vmem>>) attributes {dimension_semantics = [#tpu.dimension_semantics<parallel>], iteration_bounds = array<i64: 2>, scalar_prefetch = 0 : i64, scratch_operands = 0 : i64, tpu.core_type = #tpu.core_type<tc>, window_params = [{transform_indices = @transform_0, window_bounds = array<i64: 1>}, {transform_indices = @transform_1, window_bounds = array<i64: 512, 1024>}, {transform_indices = @transform_2, window_bounds = array<i64: 512, 1024>}]} {
    %c0 = arith.constant 0 : index
    %0 = memref.load %arg1[%c0] : memref<1xf32, #tpu.memory_space<smem>>
    %cst = arith.constant 0.000000e+00 : f32
    %1 = arith.subf %cst, %0 : f32
    %c0_0 = arith.constant 0 : index
    %c0_1 = arith.constant 0 : index
    %2 = vector.load %arg2[%c0_0, %c0_1] : memref<512x1024xf32, #tpu.memory_space<vmem>>, vector<512x1024xf32>
    %3 = vector.broadcast %1 : f32 to vector<512x1024xf32>
    %4 = arith.mulf %2, %3 : vector<512x1024xf32>
    %c0_2 = arith.constant 0 : index
    %c0_3 = arith.constant 0 : index
    %5 = vector.load %arg3[%c0_2, %c0_3] : memref<512x1024xf32, #tpu.memory_space<vmem>>, vector<512x1024xf32>
    tpu.vector_store %arg3[%c0_2, %c0_3], %4 {strides = array<i32>} : memref<512x1024xf32, #tpu.memory_space<vmem>>, vector<512x1024xf32>,
    return
  }
  func.func @transform_0(%arg0: i32) -> i32 {
    %c0_i32 = arith.constant 0 : i32
    %c0_i32_0 = arith.constant 0 : i32
    return %c0_i32 : i32
  }
  func.func @transform_1(%arg0: i32) -> (i32, i32) {
    %c0_i32 = arith.constant 0 : i32
    %c0_i32_0 = arith.constant 0 : i32
    return %arg0, %c0_i32 : i32, i32
  }
  func.func @transform_2(%arg0: i32) -> (i32, i32) {
    %c0_i32 = arith.constant 0 : i32
    %c0_i32_0 = arith.constant 0 : i32
    return %arg0, %c0_i32 : i32, i32
  }
}

</mosaic_0001>

<bundles_post_ra>
// kernel: tpu_custom_call.1
= control target key start
LH: loop header
LB: loop body
LE: loop exit
PB: predicated region body
PF: predicated region fallthrough
CT: control target
= control target key end

     0   :  { %s3694_s0 = inlined_call_operand.<no memory space> [shape: f32[1], index: 0, kind: input, shape index: {}]   ;;  %s3695_s1 = inlined_call_operand.hbm [shape: f32[1024,1024], index: 1, kind: input, shape index: {}, may-alias: {1,2}]   ;;  %s3696_s2 = inlined_call_operand.hbm [shape: f32[1024,1024], index: 2, kind: output, shape index: {}, may-alias: {1,2}]  }
   0x1   :  { %7 = sst [smem:[#allocation2]] %s3694_s0 }
   0x2   :  { %8 = vsyncpa [#allocation4], 0 }
   0x3   :  { %10 = vsyncpa [#allocation4 + $0x1], 0 }
   0x4   :  { %11 = vsyncpa [#allocation5], 0 }
   0x5   :  { %13 = vsyncpa [#allocation5 + $0x1], 0  ;;  %s1985_s11 = smov 0   ;;  %s1987_s12 = smov 0  }
   0x6   :  { %s1989_s13 = smov 0   ;;  %s1991_s14 = smov 0  }
   0x7 LB: > { %s2006_s0 = sadd.s32 4294967295, %s1959_s14   ;;  %s1793_s15 = sadd.s32 4294967294, %s1959_s14   ;;  %s1959_s14 = sphi %s1991_s14, %s3709_s14   ;;  %s1955_s13 = sphi %s1989_s13, %s3708_s13   ;;  %s1951_s12 = sphi %s1987_s12, %s3707_s12   ;;  %s1947_s11 = sphi %s1985_s11, %s3706_s11  }
   0x8   : > { %s2010_s16 = sadd.s32 1, %s1959_s14   ;;  %s47_s17 = sadd.s32 1, %s1955_s13 }
   0x9   : > { %s44_s18 = ssub.s32 %s1959_s14, %s2010_s16  ;;  %p54_p0 = scmp.ne.s32.totalorder %s1955_s13, %s1951_s12 }
   0xa   : > { %p45_p1 = scmp.eq.s32.totalorder %s44_s18, 0  ;;  %p55_p2 = scmp.eq.s32.totalorder %s1959_s14, 0 }
   0xb   : > { %p60_p3 = scmp.ne.s32.totalorder %s1951_s12, %s1947_s11  ;;  %p61_p4 = scmp.eq.s32.totalorder %s2006_s0, 0 }
   0xc   : > { %s2022_s19 = scalar_select %p45_p1, %s1955_s13, %s47_s17  }
   0xd   : > { %p2024_p5 = por %p55_p2, %p54_p0  ;;  %p2028_p6 = por %p61_p4, %p60_p3 }
   0xe   : > { %p84_p7 = scmp.eq.s32.totalorder %s2006_s0, 1  ;;  %p90_p8 = scmp.eq.s32.totalorder %s1793_s15, 1 }
   0xf   : > { %p1825_p10 = scmp.lt.s32.totalorder %s1959_s14, 2  ;;  %s113_s24 = sand.u32 1, %s1955_s13  }
  0x10   : > { %p2035_p11 = por %p84_p7, %p54_p0  ;;  %p2039_p12 = por %p90_p8, %p60_p3 }
  0x11   : > { %s1810_s25 = sshll.u32 %s1959_s14, 16  ;;  %s1796_s26 = sshll.u32 %s113_s24, 12 }
  0x12   : > { %s3700_s22 = scalar_select %p2035_p11, 1, 0 }
  0x13   : > { %s3701_s23 = scalar_select %p2039_p12, 1, 0 }
  0x14   : > { %s2048_s29 = scalar_lea.hbm %s3695_s1, %s1810_s25  ;;  %s117_s30 = scalar_lea.vmem [#allocation3], %s1796_s26 }
  0x15   : > { %s125_s3 = sshll.u32 %s117_s30, 4  ;;  %p2052_p13 = pnand %p1825_p10, %p2024_p5  ;;  %s2056_s3 = int_to_ptr.vmem [resolvable:$true] %s125_s3 }
  0x16   : > { %s2058_s5 = scalar_lea.sflag [#allocation4], %s113_s24  ;;  %s1863_s6 = scalar_lea.hbm %s2048_s29, 65536 }
  0x17   : > { %p1864_p0 = scmp.ne.s32.totalorder %s2048_s29, %s1863_s6  ;;  %p1865_p1 = pneg %p2052_p13 }
  0x18   : > { %s1868_s9 = scalar_lea.hbm %s3695_s1, 131072  ;;  %p1869_p4 = scmp.lt.u32.totalorder %s2048_s29, %s3695_s1 }
  0x19   : > { %p1866_p2 = pnand %p1865_p1, %p1864_p0  ;;  %p1870_p5 = scmp.lt.u32.totalorder %s1868_s9, %s1863_s6 }
  0x1a   : > { %p1872_p8 = scmp.lt.u32.totalorder %s1863_s6, %s2048_s29 }
  0x1b   : > { %p1867_p3 = pneg %p1866_p2  ;;  %p1871_p7 = por %p1870_p5, %p1869_p4 }
  0x1d   : > { %p1873_p10 = por %p1872_p8, %p1871_p7 }
  0x1f   : > { %p1874_p9 = pnand %p1873_p10, %p1867_p3 }
  0x21   : > { %1877 = shalt.err (!%p1874_p9)
}
  0x22   : > { %s1878_s17 = scalar_lea.vmem %s2056_s3, 65536  ;;  %s1961_s18 = smov [#allocation3]  }
  0x23   : > { %p1879_p0 = scmp.ne.s32.totalorder %s2056_s3, %s1878_s17  ;;  %s1883_s20 = sshll.u32 %s1961_s18, 4  ;;  %s1884_s20 = int_to_ptr.vmem [resolvable:$false] %s1883_s20 }
  0x24   : > { %s1885_s24 = scalar_lea.vmem %s1884_s20, 131072  ;;  %p1886_p11 = scmp.lt.s32.totalorder %s2056_s3, %s1884_s20 }
  0x25   : > { %p1881_p2 = pnand %p1879_p0, %p1865_p1  ;;  %p1887_p4 = scmp.lt.s32.totalorder %s1885_s24, %s1878_s17 }
  0x27   : > { %p1882_p12 = pneg %p1881_p2  ;;  %p1888_p5 = por %p1887_p4, %p1886_p11 }
  0x29   : > { %p1889_p7 = pnand %p1888_p5, %p1882_p12 }
  0x2b   : > { %1892 = shalt.err (!%p1889_p7)
}
  0x2c   : > { %s1962_s25 = smov 1024   ;;  %s1963_s26 = smov 64  }
  0x2d   : > { %1820 = dma.hbm_to_vmem [thread:$0]  (!%p2052_p13), %s2048_s29, 65536, %s2056_s3, %s2058_s5, %s1962_s25, %s1962_s25, %s1963_s26  }
  0x2e   : > { %p1800_p9 = scmp.ge.s32.totalorder %s1959_s14, 1  ;;  %p133_p1 = scmp.lt.s32.totalorder %s1959_s14, 3 }
  0x30   : > { %p134_p3 = pnand %p1800_p9, %p133_p1 }
  0x31   : > { %s2089_s27 = sand.u32 (!%p134_p3), 1, %s1951_s12  }
  0x32   : > { %137 = sbr.rel (%p134_p3) target bundleno = 339 (0x153), region = 28  ;;  %s1801_s28 = sshll.u32 (!%p134_p3), %s2089_s27, 12 }
  0x33   : > { %s140_s30 = scalar_lea.sflag (!%p134_p3), [#allocation4], %s2089_s27  ;;  %s2095_s6 = scalar_lea.vmem (!%p134_p3), [#allocation3], %s1801_s28 }
  0x39   : > { %1938 = dma.done.wait (%p2028_p6), %s140_s30, 65536  }
  0x3a   : > { %1940 = vsyncadd (%p2028_p6), %s140_s30, 4294901760  ;;  %s166_s29 = sld [smem:[#allocation2]]  ;;  %v168_v0 = vld [vmem:[%s2095_s6] sm:$0xff]  ;;  %v169_v1 = vld [vmem:[%s2095_s6 + $0x8] sm:$0xff]  ;;  %s2128_s21 = scalar_lea.vmem [#allocation6], %s1801_s28 }
  0x3b   : > { %v170_v2 = vld [vmem:[%s2095_s6 + $0x10] sm:$0xff]  ;;  %v171_v3 = vld [vmem:[%s2095_s6 + $0x18] sm:$0xff]  ;;  %v172_v4 = vld [vmem:[%s2095_s6 + $0x20] sm:$0xff]  ;;  %s1812_s4 = sshll.u32 %s2006_s0, 16  ;;  %s1720_s5 = sshll.u32 %s2128_s21, 4  ;;  %s3640_s5 = int_to_ptr.vmem [resolvable:$true] %s1720_s5 }
  0x3c   : > { %v173_v5 = vld [vmem:[%s2095_s6 + $0x28] sm:$0xff]  ;;  %v174_v7 = vld [vmem:[%s2095_s6 + $0x30] sm:$0xff]  ;;  %v175_v8 = vld [vmem:[%s2095_s6 + $0x38] sm:$0xff]  ;;  %s3638_s8 = scalar_lea.hbm %s3696_s2, %s1812_s4  ;;  %s1706_s9 = scalar_lea.sflag [#allocation5], %s2089_s27 }
  0x3d   : > { %v176_v9 = vld [vmem:[%s2095_s6 + $0x40] sm:$0xff]  ;;  %v177_v14 = vld [vmem:[%s2095_s6 + $0x48] sm:$0xff]  ;;  %v178_v15 = vld [vmem:[%s2095_s6 + $0x50] sm:$0xff]  ;;  %s1893_s10 = scalar_lea.vmem %s3640_s5, 65536  ;;  %p3703_p11 = scmp.ne.s32.totalorder %s3700_s22, 0 }
  0x3e   : > { %v179_v16 = vld [vmem:[%s2095_s6 + $0x58] sm:$0xff]  ;;  %v180_v21 = vld [vmem:[%s2095_s6 + $0x60] sm:$0xff]  ;;  %v181_v22 = vld [vmem:[%s2095_s6 + $0x68] sm:$0xff]  ;;  %p1894_p6 = scmp.ne.s32.totalorder %s3640_s5, %s1893_s10  ;;  %s1964_s15 = smov [#allocation6]  }
  0x3f   : > { %v182_v23 = vld [vmem:[%s2095_s6 + $0x70] sm:$0xff]  ;;  %v183_v28 = vld [vmem:[%s2095_s6 + $0x78] sm:$0xff]  ;;  %v184_v29 = vld [vmem:[%s2095_s6 + $0x80] sm:$0xff]  ;;  %s1897_s17 = sshll.u32 %s1964_s15, 4  ;;  %s1898_s17 = int_to_ptr.vmem [resolvable:$false] %s1897_s17 }
  0x40   : > { %s167_s3 = ssub.f32 0.0, %s166_s29  ;;  %v185_v30 = vld [vmem:[%s2095_s6 + $0x88] sm:$0xff]  ;;  %v186_v35 = vld [vmem:[%s2095_s6 + $0x90] sm:$0xff]  ;;  %v187_v36 = vld [vmem:[%s2095_s6 + $0x98] sm:$0xff]  ;;  %p1895_p12 = pnand %p1894_p6, %p3703_p11 }
  0x41   : > { %v188_v37 = vld [vmem:[%s2095_s6 + $0xa0] sm:$0xff]  ;;  %v189_v42 = vld [vmem:[%s2095_s6 + $0xa8] sm:$0xff]  ;;  %v190_v43 = vld [vmem:[%s2095_s6 + $0xb0] sm:$0xff]  ;;  %s1899_s18 = scalar_lea.vmem %s1898_s17, 131072  ;;  %p1900_p8 = scmp.lt.s32.totalorder %s3640_s5, %s1898_s17 }
  0x42   : > { %v2107_v6 = vstv %s167_s3  ;;  %v191_v44 = vld [vmem:[%s2095_s6 + $0xb8] sm:$0xff]  ;;  %v192_v49 = vld [vmem:[%s2095_s6 + $0xc0] sm:$0xff]  ;;  %v193_v50 = vld [vmem:[%s2095_s6 + $0xc8] sm:$0xff]  ;;  %p1896_p13 = pneg %p1895_p12  ;;  %p1901_p10 = scmp.lt.s32.totalorder %s1899_s18, %s1893_s10 }
  0x43   : > { %v681_v10 = vmul.f32 %v2107_v6, %v168_v0  ;;  %v682_v11 = vmul.f32 %v2107_v6, %v169_v1  ;;  %v683_v12 = vmul.f32 %v2107_v6, %v170_v2  ;;  %v684_v13 = vmul.f32 %v2107_v6, %v171_v3  ;;  %v194_v51 = vld [vmem:[%s2095_s6 + $0xd0] sm:$0xff]  ;;  %v195_v55 = vld [vmem:[%s2095_s6 + $0xd8] sm:$0xff]  ;;  %v196_v56 = vld [vmem:[%s2095_s6 + $0xe0] sm:$0xff] }
  0x44   : > { %v685_v17 = vmul.f32 %v2107_v6, %v172_v4  ;;  %v686_v18 = vmul.f32 %v2107_v6, %v173_v5  ;;  %v687_v19 = vmul.f32 %v2107_v6, %v174_v7  ;;  %v688_v20 = vmul.f32 %v2107_v6, %v175_v8  ;;  %v197_v57 = vld [vmem:[%s2095_s6 + $0xe8] sm:$0xff]  ;;  %v198_v61 = vld [vmem:[%s2095_s6 + $0xf0] sm:$0xff]  ;;  %v199_v62 = vld [vmem:[%s2095_s6 + $0xf8] sm:$0xff]  ;;  %p1902_p0 = por %p1901_p10, %p1900_p8 }
  0x45   : > { %1193 = vst [vmem:[%s2128_s21] sm:$0xff] %v681_v10  ;;  %1194 = vst [vmem:[%s2128_s21 + $0x8] sm:$0xff] %v682_v11  ;;  %v689_v24 = vmul.f32 %v2107_v6, %v176_v9  ;;  %v690_v25 = vmul.f32 %v2107_v6, %v177_v14  ;;  %v691_v26 = vmul.f32 %v2107_v6, %v178_v15  ;;  %v200_v63 = vld [vmem:[%s2095_s6 + $0x100] sm:$0xff]  ;;  %v201_v3 = vld [vmem:[%s2095_s6 + $0x108] sm:$0xff] }
  0x46   : > { %1195 = vst [vmem:[%s2128_s21 + $0x10] sm:$0xff] %v683_v12  ;;  %1196 = vst [vmem:[%s2128_s21 + $0x18] sm:$0xff] %v684_v13  ;;  %v692_v27 = vmul.f32 %v2107_v6, %v179_v16  ;;  %v693_v31 = vmul.f32 %v2107_v6, %v180_v21  ;;  %v694_v32 = vmul.f32 %v2107_v6, %v181_v22  ;;  %v202_v4 = vld [vmem:[%s2095_s6 + $0x110] sm:$0xff]  ;;  %v203_v5 = vld [vmem:[%s2095_s6 + $0x118] sm:$0xff]  ;;  %p1903_p2 = pnand %p1902_p0, %p1896_p13 }
  0x47   : > { %1197 = vst [vmem:[%s2128_s21 + $0x20] sm:$0xff] %v685_v17  ;;  %1198 = vst [vmem:[%s2128_s21 + $0x28] sm:$0xff] %v686_v18  ;;  %v695_v33 = vmul.f32 %v2107_v6, %v182_v23  ;;  %v696_v34 = vmul.f32 %v2107_v6, %v183_v28  ;;  %v697_v38 = vmul.f32 %v2107_v6, %v184_v29  ;;  %v204_v10 = vld [vmem:[%s2095_s6 + $0x120] sm:$0xff]  ;;  %v205_v11 = vld [vmem:[%s2095_s6 + $0x128] sm:$0xff] }
  0x48   : > { %1199 = vst [vmem:[%s2128_s21 + $0x30] sm:$0xff] %v687_v19  ;;  %1200 = vst [vmem:[%s2128_s21 + $0x38] sm:$0xff] %v688_v20  ;;  %v698_v39 = vmul.f32 %v2107_v6, %v185_v30  ;;  %v699_v40 = vmul.f32 %v2107_v6, %v186_v35  ;;  %v700_v41 = vmul.f32 %v2107_v6, %v187_v36  ;;  %v206_v12 = vld [vmem:[%s2095_s6 + $0x130] sm:$0xff]  ;;  %v207_v16 = vld [vmem:[%s2095_s6 + $0x138] sm:$0xff] }
  0x49   : > { %1201 = vst [vmem:[%s2128_s21 + $0x40] sm:$0xff] %v689_v24  ;;  %1202 = vst [vmem:[%s2128_s21 + $0x48] sm:$0xff] %v690_v25  ;;  %v701_v45 = vmul.f32 %v2107_v6, %v188_v37  ;;  %v702_v46 = vmul.f32 %v2107_v6, %v189_v42  ;;  %v703_v47 = vmul.f32 %v2107_v6, %v190_v43  ;;  %v208_v17 = vld [vmem:[%s2095_s6 + $0x140] sm:$0xff]  ;;  %v209_v18 = vld [vmem:[%s2095_s6 + $0x148] sm:$0xff] }
  0x4a   : > { %1203 = vst [vmem:[%s2128_s21 + $0x50] sm:$0xff] %v691_v26  ;;  %1204 = vst [vmem:[%s2128_s21 + $0x58] sm:$0xff] %v692_v27  ;;  %v704_v48 = vmul.f32 %v2107_v6, %v191_v44  ;;  %v705_v52 = vmul.f32 %v2107_v6, %v192_v49  ;;  %v706_v53 = vmul.f32 %v2107_v6, %v193_v50  ;;  %v210_v22 = vld [vmem:[%s2095_s6 + $0x150] sm:$0xff]  ;;  %v211_v23 = vld [vmem:[%s2095_s6 + $0x158] sm:$0xff] }
  0x4b   : > { %1205 = vst [vmem:[%s2128_s21 + $0x60] sm:$0xff] %v693_v31  ;;  %1206 = vst [vmem:[%s2128_s21 + $0x68] sm:$0xff] %v694_v32  ;;  %v707_v54 = vmul.f32 %v2107_v6, %v194_v51  ;;  %v708_v58 = vmul.f32 %v2107_v6, %v195_v55  ;;  %v709_v59 = vmul.f32 %v2107_v6, %v196_v56  ;;  %v212_v24 = vld [vmem:[%s2095_s6 + $0x160] sm:$0xff]  ;;  %v213_v28 = vld [vmem:[%s2095_s6 + $0x168] sm:$0xff] }
  0x4c   : > { %1207 = vst [vmem:[%s2128_s21 + $0x70] sm:$0xff] %v695_v33  ;;  %1208 = vst [vmem:[%s2128_s21 + $0x78] sm:$0xff] %v696_v34  ;;  %v710_v60 = vmul.f32 %v2107_v6, %v197_v57  ;;  %v711_v0 = vmul.f32 %v2107_v6, %v198_v61  ;;  %v712_v1 = vmul.f32 %v2107_v6, %v199_v62  ;;  %v214_v29 = vld [vmem:[%s2095_s6 + $0x170] sm:$0xff]  ;;  %v215_v30 = vld [vmem:[%s2095_s6 + $0x178] sm:$0xff] }
  0x4d   : > { %1209 = vst [vmem:[%s2128_s21 + $0x80] sm:$0xff] %v697_v38  ;;  %1210 = vst [vmem:[%s2128_s21 + $0x88] sm:$0xff] %v698_v39  ;;  %v713_v2 = vmul.f32 %v2107_v6, %v200_v63  ;;  %v714_v7 = vmul.f32 %v2107_v6, %v201_v3  ;;  %v715_v8 = vmul.f32 %v2107_v6, %v202_v4  ;;  %v216_v34 = vld [vmem:[%s2095_s6 + $0x180] sm:$0xff]  ;;  %v217_v35 = vld [vmem:[%s2095_s6 + $0x188] sm:$0xff] }
  0x4e   : > { %1211 = vst [vmem:[%s2128_s21 + $0x90] sm:$0xff] %v699_v40  ;;  %1212 = vst [vmem:[%s2128_s21 + $0x98] sm:$0xff] %v700_v41  ;;  %v716_v9 = vmul.f32 %v2107_v6, %v203_v5  ;;  %v717_v13 = vmul.f32 %v2107_v6, %v204_v10  ;;  %v718_v14 = vmul.f32 %v2107_v6, %v205_v11  ;;  %v218_v36 = vld [vmem:[%s2095_s6 + $0x190] sm:$0xff]  ;;  %v219_v40 = vld [vmem:[%s2095_s6 + $0x198] sm:$0xff] }
  0x4f   : > { %1213 = vst [vmem:[%s2128_s21 + $0xa0] sm:$0xff] %v701_v45  ;;  %1214 = vst [vmem:[%s2128_s21 + $0xa8] sm:$0xff] %v702_v46  ;;  %v719_v15 = vmul.f32 %v2107_v6, %v206_v12  ;;  %v720_v19 = vmul.f32 %v2107_v6, %v207_v16  ;;  %v721_v20 = vmul.f32 %v2107_v6, %v208_v17  ;;  %v220_v41 = vld [vmem:[%s2095_s6 + $0x1a0] sm:$0xff]  ;;  %v221_v42 = vld [vmem:[%s2095_s6 + $0x1a8] sm:$0xff] }
  0x50   : > { %1215 = vst [vmem:[%s2128_s21 + $0xb0] sm:$0xff] %v703_v47  ;;  %1216 = vst [vmem:[%s2128_s21 + $0xb8] sm:$0xff] %v704_v48  ;;  %v722_v21 = vmul.f32 %v2107_v6, %v209_v18  ;;  %v723_v25 = vmul.f32 %v2107_v6, %v210_v22  ;;  %v724_v26 = vmul.f32 %v2107_v6, %v211_v23  ;;  %v222_v46 = vld [vmem:[%s2095_s6 + $0x1b0] sm:$0xff]  ;;  %v223_v47 = vld [vmem:[%s2095_s6 + $0x1b8] sm:$0xff] }
  0x51   : > { %1217 = vst [vmem:[%s2128_s21 + $0xc0] sm:$0xff] %v705_v52  ;;  %1218 = vst [vmem:[%s2128_s21 + $0xc8] sm:$0xff] %v706_v53  ;;  %v725_v27 = vmul.f32 %v2107_v6, %v212_v24  ;;  %v726_v31 = vmul.f32 %v2107_v6, %v213_v28  ;;  %v727_v32 = vmul.f32 %v2107_v6, %v214_v29  ;;  %v224_v48 = vld [vmem:[%s2095_s6 + $0x1c0] sm:$0xff]  ;;  %v225_v52 = vld [vmem:[%s2095_s6 + $0x1c8] sm:$0xff] }
  0x52   : > { %1219 = vst [vmem:[%s2128_s21 + $0xd0] sm:$0xff] %v707_v54  ;;  %1220 = vst [vmem:[%s2128_s21 + $0xd8] sm:$0xff] %v708_v58  ;;  %v728_v33 = vmul.f32 %v2107_v6, %v215_v30  ;;  %v729_v37 = vmul.f32 %v2107_v6, %v216_v34  ;;  %v730_v38 = vmul.f32 %v2107_v6, %v217_v35  ;;  %v226_v53 = vld [vmem:[%s2095_s6 + $0x1d0] sm:$0xff]  ;;  %v227_v54 = vld [vmem:[%s2095_s6 + $0x1d8] sm:$0xff] }
  0x53   : > { %1221 = vst [vmem:[%s2128_s21 + $0xe0] sm:$0xff] %v709_v59  ;;  %1222 = vst [vmem:[%s2128_s21 + $0xe8] sm:$0xff] %v710_v60  ;;  %v731_v39 = vmul.f32 %v2107_v6, %v218_v36  ;;  %v732_v43 = vmul.f32 %v2107_v6, %v219_v40  ;;  %v733_v44 = vmul.f32 %v2107_v6, %v220_v41  ;;  %v228_v58 = vld [vmem:[%s2095_s6 + $0x1e0] sm:$0xff]  ;;  %v229_v59 = vld [vmem:[%s2095_s6 + $0x1e8] sm:$0xff] }
  0x54   : > { %1223 = vst [vmem:[%s2128_s21 + $0xf0] sm:$0xff] %v711_v0  ;;  %1224 = vst [vmem:[%s2128_s21 + $0xf8] sm:$0xff] %v712_v1  ;;  %v734_v45 = vmul.f32 %v2107_v6, %v221_v42  ;;  %v735_v49 = vmul.f32 %v2107_v6, %v222_v46  ;;  %v736_v50 = vmul.f32 %v2107_v6, %v223_v47  ;;  %v230_v60 = vld [vmem:[%s2095_s6 + $0x1f0] sm:$0xff]  ;;  %v231_v0 = vld [vmem:[%s2095_s6 + $0x1f8] sm:$0xff] }
  0x55   : > { %1225 = vst [vmem:[%s2128_s21 + $0x100] sm:$0xff] %v713_v2  ;;  %1226 = vst [vmem:[%s2128_s21 + $0x108] sm:$0xff] %v714_v7  ;;  %v737_v51 = vmul.f32 %v2107_v6, %v224_v48  ;;  %v738_v55 = vmul.f32 %v2107_v6, %v225_v52  ;;  %v739_v56 = vmul.f32 %v2107_v6, %v226_v53  ;;  %v232_v1 = vld [vmem:[%s2095_s6 + $0x200] sm:$0xff]  ;;  %v233_v2 = vld [vmem:[%s2095_s6 + $0x208] sm:$0xff] }
  0x56   : > { %1227 = vst [vmem:[%s2128_s21 + $0x110] sm:$0xff] %v715_v8  ;;  %1228 = vst [vmem:[%s2128_s21 + $0x118] sm:$0xff] %v716_v9  ;;  %v740_v57 = vmul.f32 %v2107_v6, %v227_v54  ;;  %v741_v61 = vmul.f32 %v2107_v6, %v228_v58  ;;  %v742_v62 = vmul.f32 %v2107_v6, %v229_v59  ;;  %v234_v7 = vld [vmem:[%s2095_s6 + $0x210] sm:$0xff]  ;;  %v235_v8 = vld [vmem:[%s2095_s6 + $0x218] sm:$0xff] }
  0x57   : > { %1229 = vst [vmem:[%s2128_s21 + $0x120] sm:$0xff] %v717_v13  ;;  %1230 = vst [vmem:[%s2128_s21 + $0x128] sm:$0xff] %v718_v14  ;;  %v743_v63 = vmul.f32 %v2107_v6, %v230_v60  ;;  %v744_v3 = vmul.f32 %v2107_v6, %v231_v0  ;;  %v745_v4 = vmul.f32 %v2107_v6, %v232_v1  ;;  %v236_v9 = vld [vmem:[%s2095_s6 + $0x220] sm:$0xff]  ;;  %v237_v13 = vld [vmem:[%s2095_s6 + $0x228] sm:$0xff] }
  0x58   : > { %1231 = vst [vmem:[%s2128_s21 + $0x130] sm:$0xff] %v719_v15  ;;  %1232 = vst [vmem:[%s2128_s21 + $0x138] sm:$0xff] %v720_v19  ;;  %v746_v5 = vmul.f32 %v2107_v6, %v233_v2  ;;  %v747_v10 = vmul.f32 %v2107_v6, %v234_v7  ;;  %v748_v11 = vmul.f32 %v2107_v6, %v235_v8  ;;  %v238_v14 = vld [vmem:[%s2095_s6 + $0x230] sm:$0xff]  ;;  %v239_v15 = vld [vmem:[%s2095_s6 + $0x238] sm:$0xff] }
  0x59   : > { %1233 = vst [vmem:[%s2128_s21 + $0x140] sm:$0xff] %v721_v20  ;;  %1234 = vst [vmem:[%s2128_s21 + $0x148] sm:$0xff] %v722_v21  ;;  %v749_v12 = vmul.f32 %v2107_v6, %v236_v9  ;;  %v750_v16 = vmul.f32 %v2107_v6, %v237_v13  ;;  %v751_v17 = vmul.f32 %v2107_v6, %v238_v14  ;;  %v240_v19 = vld [vmem:[%s2095_s6 + $0x240] sm:$0xff]  ;;  %v241_v20 = vld [vmem:[%s2095_s6 + $0x248] sm:$0xff] }
  0x5a   : > { %1235 = vst [vmem:[%s2128_s21 + $0x150] sm:$0xff] %v723_v25  ;;  %1236 = vst [vmem:[%s2128_s21 + $0x158] sm:$0xff] %v724_v26  ;;  %v752_v18 = vmul.f32 %v2107_v6, %v239_v15  ;;  %v242_v21 = vld [vmem:[%s2095_s6 + $0x250] sm:$0xff]  ;;  %v753_v22 = vmul.f32 %v2107_v6, %v240_v19  ;;  %v754_v23 = vmul.f32 %v2107_v6, %v241_v20  ;;  %v243_v25 = vld [vmem:[%s2095_s6 + $0x258] sm:$0xff] }
  0x5b   : > { %1237 = vst [vmem:[%s2128_s21 + $0x160] sm:$0xff] %v725_v27  ;;  %1238 = vst [vmem:[%s2128_s21 + $0x168] sm:$0xff] %v726_v31  ;;  %v755_v24 = vmul.f32 %v2107_v6, %v242_v21  ;;  %v244_v26 = vld [vmem:[%s2095_s6 + $0x260] sm:$0xff]  ;;  %v245_v27 = vld [vmem:[%s2095_s6 + $0x268] sm:$0xff]  ;;  %v756_v28 = vmul.f32 %v2107_v6, %v243_v25 }
  0x5c   : > { %1239 = vst [vmem:[%s2128_s21 + $0x170] sm:$0xff] %v727_v32  ;;  %1240 = vst [vmem:[%s2128_s21 + $0x178] sm:$0xff] %v728_v33  ;;  %v757_v29 = vmul.f32 %v2107_v6, %v244_v26  ;;  %v758_v30 = vmul.f32 %v2107_v6, %v245_v27  ;;  %v246_v31 = vld [vmem:[%s2095_s6 + $0x270] sm:$0xff]  ;;  %v247_v32 = vld [vmem:[%s2095_s6 + $0x278] sm:$0xff] }
  0x5d   : > { %1241 = vst [vmem:[%s2128_s21 + $0x180] sm:$0xff] %v729_v37  ;;  %1242 = vst [vmem:[%s2128_s21 + $0x188] sm:$0xff] %v730_v38  ;;  %v248_v33 = vld [vmem:[%s2095_s6 + $0x280] sm:$0xff]  ;;  %v759_v34 = vmul.f32 %v2107_v6, %v246_v31  ;;  %v760_v35 = vmul.f32 %v2107_v6, %v247_v32  ;;  %v249_v37 = vld [vmem:[%s2095_s6 + $0x288] sm:$0xff] }
  0x5e   : > { %1243 = vst [vmem:[%s2128_s21 + $0x190] sm:$0xff] %v731_v39  ;;  %1244 = vst [vmem:[%s2128_s21 + $0x198] sm:$0xff] %v732_v43  ;;  %v761_v36 = vmul.f32 %v2107_v6, %v248_v33  ;;  %v250_v38 = vld [vmem:[%s2095_s6 + $0x290] sm:$0xff]  ;;  %v251_v39 = vld [vmem:[%s2095_s6 + $0x298] sm:$0xff]  ;;  %v762_v40 = vmul.f32 %v2107_v6, %v249_v37 }
  0x5f   : > { %1245 = vst [vmem:[%s2128_s21 + $0x1a0] sm:$0xff] %v733_v44  ;;  %1246 = vst [vmem:[%s2128_s21 + $0x1a8] sm:$0xff] %v734_v45  ;;  %v763_v41 = vmul.f32 %v2107_v6, %v250_v38  ;;  %v764_v42 = vmul.f32 %v2107_v6, %v251_v39  ;;  %v252_v43 = vld [vmem:[%s2095_s6 + $0x2a0] sm:$0xff]  ;;  %v253_v44 = vld [vmem:[%s2095_s6 + $0x2a8] sm:$0xff] }
  0x60   : > { %1247 = vst [vmem:[%s2128_s21 + $0x1b0] sm:$0xff] %v735_v49  ;;  %1248 = vst [vmem:[%s2128_s21 + $0x1b8] sm:$0xff] %v736_v50  ;;  %v254_v45 = vld [vmem:[%s2095_s6 + $0x2b0] sm:$0xff]  ;;  %v765_v46 = vmul.f32 %v2107_v6, %v252_v43  ;;  %v766_v47 = vmul.f32 %v2107_v6, %v253_v44  ;;  %v255_v49 = vld [vmem:[%s2095_s6 + $0x2b8] sm:$0xff] }
  0x61   : > { %1249 = vst [vmem:[%s2128_s21 + $0x1c0] sm:$0xff] %v737_v51  ;;  %1250 = vst [vmem:[%s2128_s21 + $0x1c8] sm:$0xff] %v738_v55  ;;  %v767_v48 = vmul.f32 %v2107_v6, %v254_v45  ;;  %v256_v50 = vld [vmem:[%s2095_s6 + $0x2c0] sm:$0xff]  ;;  %v257_v51 = vld [vmem:[%s2095_s6 + $0x2c8] sm:$0xff]  ;;  %v768_v52 = vmul.f32 %v2107_v6, %v255_v49 }
  0x62   : > { %1251 = vst [vmem:[%s2128_s21 + $0x1d0] sm:$0xff] %v739_v56  ;;  %1252 = vst [vmem:[%s2128_s21 + $0x1d8] sm:$0xff] %v740_v57  ;;  %v769_v53 = vmul.f32 %v2107_v6, %v256_v50  ;;  %v770_v54 = vmul.f32 %v2107_v6, %v257_v51  ;;  %v258_v55 = vld [vmem:[%s2095_s6 + $0x2d0] sm:$0xff]  ;;  %v259_v56 = vld [vmem:[%s2095_s6 + $0x2d8] sm:$0xff] }
  0x63   : > { %1253 = vst [vmem:[%s2128_s21 + $0x1e0] sm:$0xff] %v741_v61  ;;  %1254 = vst [vmem:[%s2128_s21 + $0x1e8] sm:$0xff] %v742_v62  ;;  %v260_v57 = vld [vmem:[%s2095_s6 + $0x2e0] sm:$0xff]  ;;  %v771_v58 = vmul.f32 %v2107_v6, %v258_v55  ;;  %v772_v59 = vmul.f32 %v2107_v6, %v259_v56  ;;  %v261_v61 = vld [vmem:[%s2095_s6 + $0x2e8] sm:$0xff] }
  0x64   : > { %1255 = vst [vmem:[%s2128_s21 + $0x1f0] sm:$0xff] %v743_v63  ;;  %1256 = vst [vmem:[%s2128_s21 + $0x1f8] sm:$0xff] %v744_v3  ;;  %v773_v60 = vmul.f32 %v2107_v6, %v260_v57  ;;  %v262_v62 = vld [vmem:[%s2095_s6 + $0x2f0] sm:$0xff]  ;;  %v263_v63 = vld [vmem:[%s2095_s6 + $0x2f8] sm:$0xff]  ;;  %v774_v0 = vmul.f32 %v2107_v6, %v261_v61 }
  0x65   : > { %1257 = vst [vmem:[%s2128_s21 + $0x200] sm:$0xff] %v745_v4  ;;  %1258 = vst [vmem:[%s2128_s21 + $0x208] sm:$0xff] %v746_v5  ;;  %v775_v1 = vmul.f32 %v2107_v6, %v262_v62  ;;  %v776_v2 = vmul.f32 %v2107_v6, %v263_v63  ;;  %v264_v3 = vld [vmem:[%s2095_s6 + $0x300] sm:$0xff]  ;;  %v265_v4 = vld [vmem:[%s2095_s6 + $0x308] sm:$0xff] }
  0x66   : > { %1259 = vst [vmem:[%s2128_s21 + $0x210] sm:$0xff] %v747_v10  ;;  %1260 = vst [vmem:[%s2128_s21 + $0x218] sm:$0xff] %v748_v11  ;;  %v266_v5 = vld [vmem:[%s2095_s6 + $0x310] sm:$0xff]  ;;  %v777_v7 = vmul.f32 %v2107_v6, %v264_v3  ;;  %v778_v8 = vmul.f32 %v2107_v6, %v265_v4  ;;  %v267_v10 = vld [vmem:[%s2095_s6 + $0x318] sm:$0xff] }
  0x67   : > { %1261 = vst [vmem:[%s2128_s21 + $0x220] sm:$0xff] %v749_v12  ;;  %1262 = vst [vmem:[%s2128_s21 + $0x228] sm:$0xff] %v750_v16  ;;  %v779_v9 = vmul.f32 %v2107_v6, %v266_v5  ;;  %v268_v11 = vld [vmem:[%s2095_s6 + $0x320] sm:$0xff]  ;;  %v269_v12 = vld [vmem:[%s2095_s6 + $0x328] sm:$0xff]  ;;  %v780_v13 = vmul.f32 %v2107_v6, %v267_v10 }
  0x68   : > { %1263 = vst [vmem:[%s2128_s21 + $0x230] sm:$0xff] %v751_v17  ;;  %1264 = vst [vmem:[%s2128_s21 + $0x238] sm:$0xff] %v752_v18  ;;  %v781_v14 = vmul.f32 %v2107_v6, %v268_v11  ;;  %v782_v15 = vmul.f32 %v2107_v6, %v269_v12  ;;  %v270_v16 = vld [vmem:[%s2095_s6 + $0x330] sm:$0xff]  ;;  %v271_v17 = vld [vmem:[%s2095_s6 + $0x338] sm:$0xff] }
  0x69   : > { %1265 = vst [vmem:[%s2128_s21 + $0x240] sm:$0xff] %v753_v22  ;;  %1266 = vst [vmem:[%s2128_s21 + $0x248] sm:$0xff] %v754_v23  ;;  %v272_v18 = vld [vmem:[%s2095_s6 + $0x340] sm:$0xff]  ;;  %v783_v19 = vmul.f32 %v2107_v6, %v270_v16  ;;  %v784_v20 = vmul.f32 %v2107_v6, %v271_v17  ;;  %v273_v22 = vld [vmem:[%s2095_s6 + $0x348] sm:$0xff] }
  0x6a   : > { %1267 = vst [vmem:[%s2128_s21 + $0x250] sm:$0xff] %v755_v24  ;;  %1268 = vst [vmem:[%s2128_s21 + $0x258] sm:$0xff] %v756_v28  ;;  %v785_v21 = vmul.f32 %v2107_v6, %v272_v18  ;;  %v274_v23 = vld [vmem:[%s2095_s6 + $0x350] sm:$0xff]  ;;  %v275_v24 = vld [vmem:[%s2095_s6 + $0x358] sm:$0xff]  ;;  %v786_v25 = vmul.f32 %v2107_v6, %v273_v22 }
  0x6b   : > { %1269 = vst [vmem:[%s2128_s21 + $0x260] sm:$0xff] %v757_v29  ;;  %1270 = vst [vmem:[%s2128_s21 + $0x268] sm:$0xff] %v758_v30  ;;  %v787_v26 = vmul.f32 %v2107_v6, %v274_v23  ;;  %v788_v27 = vmul.f32 %v2107_v6, %v275_v24  ;;  %v276_v28 = vld [vmem:[%s2095_s6 + $0x360] sm:$0xff]  ;;  %v277_v29 = vld [vmem:[%s2095_s6 + $0x368] sm:$0xff] }
  0x6c   : > { %1271 = vst [vmem:[%s2128_s21 + $0x270] sm:$0xff] %v759_v34  ;;  %1272 = vst [vmem:[%s2128_s21 + $0x278] sm:$0xff] %v760_v35  ;;  %v278_v30 = vld [vmem:[%s2095_s6 + $0x370] sm:$0xff]  ;;  %v789_v31 = vmul.f32 %v2107_v6, %v276_v28  ;;  %v790_v32 = vmul.f32 %v2107_v6, %v277_v29  ;;  %v279_v34 = vld [vmem:[%s2095_s6 + $0x378] sm:$0xff] }
  0x6d   : > { %1273 = vst [vmem:[%s2128_s21 + $0x280] sm:$0xff] %v761_v36  ;;  %1274 = vst [vmem:[%s2128_s21 + $0x288] sm:$0xff] %v762_v40  ;;  %v791_v33 = vmul.f32 %v2107_v6, %v278_v30  ;;  %v280_v35 = vld [vmem:[%s2095_s6 + $0x380] sm:$0xff]  ;;  %v281_v36 = vld [vmem:[%s2095_s6 + $0x388] sm:$0xff]  ;;  %v792_v37 = vmul.f32 %v2107_v6, %v279_v34 }
  0x6e   : > { %1275 = vst [vmem:[%s2128_s21 + $0x290] sm:$0xff] %v763_v41  ;;  %1276 = vst [vmem:[%s2128_s21 + $0x298] sm:$0xff] %v764_v42  ;;  %v793_v38 = vmul.f32 %v2107_v6, %v280_v35  ;;  %v794_v39 = vmul.f32 %v2107_v6, %v281_v36  ;;  %v282_v40 = vld [vmem:[%s2095_s6 + $0x390] sm:$0xff]  ;;  %v283_v41 = vld [vmem:[%s2095_s6 + $0x398] sm:$0xff] }
  0x6f   : > { %1277 = vst [vmem:[%s2128_s21 + $0x2a0] sm:$0xff] %v765_v46  ;;  %1278 = vst [vmem:[%s2128_s21 + $0x2a8] sm:$0xff] %v766_v47  ;;  %v284_v42 = vld [vmem:[%s2095_s6 + $0x3a0] sm:$0xff]  ;;  %v795_v43 = vmul.f32 %v2107_v6, %v282_v40  ;;  %v796_v44 = vmul.f32 %v2107_v6, %v283_v41  ;;  %v285_v46 = vld [vmem:[%s2095_s6 + $0x3a8] sm:$0xff] }
  0x70   : > { %1279 = vst [vmem:[%s2128_s21 + $0x2b0] sm:$0xff] %v767_v48  ;;  %1280 = vst [vmem:[%s2128_s21 + $0x2b8] sm:$0xff] %v768_v52  ;;  %v797_v45 = vmul.f32 %v2107_v6, %v284_v42  ;;  %v286_v47 = vld [vmem:[%s2095_s6 + $0x3b0] sm:$0xff]  ;;  %v287_v48 = vld [vmem:[%s2095_s6 + $0x3b8] sm:$0xff]  ;;  %v798_v49 = vmul.f32 %v2107_v6, %v285_v46 }
  0x71   : > { %1281 = vst [vmem:[%s2128_s21 + $0x2c0] sm:$0xff] %v769_v53  ;;  %1282 = vst [vmem:[%s2128_s21 + $0x2c8] sm:$0xff] %v770_v54  ;;  %v799_v50 = vmul.f32 %v2107_v6, %v286_v47  ;;  %v800_v51 = vmul.f32 %v2107_v6, %v287_v48  ;;  %v288_v52 = vld [vmem:[%s2095_s6 + $0x3c0] sm:$0xff]  ;;  %v289_v53 = vld [vmem:[%s2095_s6 + $0x3c8] sm:$0xff] }
  0x72   : > { %1283 = vst [vmem:[%s2128_s21 + $0x2d0] sm:$0xff] %v771_v58  ;;  %1284 = vst [vmem:[%s2128_s21 + $0x2d8] sm:$0xff] %v772_v59  ;;  %v290_v54 = vld [vmem:[%s2095_s6 + $0x3d0] sm:$0xff]  ;;  %v801_v55 = vmul.f32 %v2107_v6, %v288_v52  ;;  %v802_v56 = vmul.f32 %v2107_v6, %v289_v53  ;;  %v291_v58 = vld [vmem:[%s2095_s6 + $0x3d8] sm:$0xff] }
  0x73   : > { %1285 = vst [vmem:[%s2128_s21 + $0x2e0] sm:$0xff] %v773_v60  ;;  %1286 = vst [vmem:[%s2128_s21 + $0x2e8] sm:$0xff] %v774_v0  ;;  %v803_v57 = vmul.f32 %v2107_v6, %v290_v54  ;;  %v292_v59 = vld [vmem:[%s2095_s6 + $0x3e0] sm:$0xff]  ;;  %v293_v60 = vld [vmem:[%s2095_s6 + $0x3e8] sm:$0xff]  ;;  %v804_v61 = vmul.f32 %v2107_v6, %v291_v58 }
  0x74   : > { %1287 = vst [vmem:[%s2128_s21 + $0x2f0] sm:$0xff] %v775_v1  ;;  %1288 = vst [vmem:[%s2128_s21 + $0x2f8] sm:$0xff] %v776_v2  ;;  %v805_v62 = vmul.f32 %v2107_v6, %v292_v59  ;;  %v806_v63 = vmul.f32 %v2107_v6, %v293_v60  ;;  %v294_v0 = vld [vmem:[%s2095_s6 + $0x3f0] sm:$0xff]  ;;  %v295_v1 = vld [vmem:[%s2095_s6 + $0x3f8] sm:$0xff] }
  0x75   : > { %1289 = vst [vmem:[%s2128_s21 + $0x300] sm:$0xff] %v777_v7  ;;  %1290 = vst [vmem:[%s2128_s21 + $0x308] sm:$0xff] %v778_v8  ;;  %v296_v2 = vld [vmem:[%s2095_s6 + $0x400] sm:$0xff]  ;;  %v807_v3 = vmul.f32 %v2107_v6, %v294_v0  ;;  %v808_v4 = vmul.f32 %v2107_v6, %v295_v1  ;;  %v297_v7 = vld [vmem:[%s2095_s6 + $0x408] sm:$0xff] }
  0x76   : > { %1291 = vst [vmem:[%s2128_s21 + $0x310] sm:$0xff] %v779_v9  ;;  %1292 = vst [vmem:[%s2128_s21 + $0x318] sm:$0xff] %v780_v13  ;;  %v809_v5 = vmul.f32 %v2107_v6, %v296_v2  ;;  %v298_v8 = vld [vmem:[%s2095_s6 + $0x410] sm:$0xff]  ;;  %v299_v9 = vld [vmem:[%s2095_s6 + $0x418] sm:$0xff]  ;;  %v810_v10 = vmul.f32 %v2107_v6, %v297_v7 }
  0x77   : > { %1293 = vst [vmem:[%s2128_s21 + $0x320] sm:$0xff] %v781_v14  ;;  %1294 = vst [vmem:[%s2128_s21 + $0x328] sm:$0xff] %v782_v15  ;;  %v811_v11 = vmul.f32 %v2107_v6, %v298_v8  ;;  %v812_v12 = vmul.f32 %v2107_v6, %v299_v9  ;;  %v300_v13 = vld [vmem:[%s2095_s6 + $0x420] sm:$0xff]  ;;  %v301_v14 = vld [vmem:[%s2095_s6 + $0x428] sm:$0xff] }
  0x78   : > { %1295 = vst [vmem:[%s2128_s21 + $0x330] sm:$0xff] %v783_v19  ;;  %1296 = vst [vmem:[%s2128_s21 + $0x338] sm:$0xff] %v784_v20  ;;  %v302_v15 = vld [vmem:[%s2095_s6 + $0x430] sm:$0xff]  ;;  %v813_v16 = vmul.f32 %v2107_v6, %v300_v13  ;;  %v814_v17 = vmul.f32 %v2107_v6, %v301_v14  ;;  %v303_v19 = vld [vmem:[%s2095_s6 + $0x438] sm:$0xff] }
  0x79   : > { %1297 = vst [vmem:[%s2128_s21 + $0x340] sm:$0xff] %v785_v21  ;;  %1298 = vst [vmem:[%s2128_s21 + $0x348] sm:$0xff] %v786_v25  ;;  %v815_v18 = vmul.f32 %v2107_v6, %v302_v15  ;;  %v304_v20 = vld [vmem:[%s2095_s6 + $0x440] sm:$0xff]  ;;  %v305_v21 = vld [vmem:[%s2095_s6 + $0x448] sm:$0xff]  ;;  %v816_v22 = vmul.f32 %v2107_v6, %v303_v19 }
  0x7a   : > { %1299 = vst [vmem:[%s2128_s21 + $0x350] sm:$0xff] %v787_v26  ;;  %1300 = vst [vmem:[%s2128_s21 + $0x358] sm:$0xff] %v788_v27  ;;  %v817_v23 = vmul.f32 %v2107_v6, %v304_v20  ;;  %v818_v24 = vmul.f32 %v2107_v6, %v305_v21  ;;  %v306_v25 = vld [vmem:[%s2095_s6 + $0x450] sm:$0xff]  ;;  %v307_v26 = vld [vmem:[%s2095_s6 + $0x458] sm:$0xff] }
  0x7b   : > { %1301 = vst [vmem:[%s2128_s21 + $0x360] sm:$0xff] %v789_v31  ;;  %1302 = vst [vmem:[%s2128_s21 + $0x368] sm:$0xff] %v790_v32  ;;  %v308_v27 = vld [vmem:[%s2095_s6 + $0x460] sm:$0xff]  ;;  %v819_v28 = vmul.f32 %v2107_v6, %v306_v25  ;;  %v820_v29 = vmul.f32 %v2107_v6, %v307_v26  ;;  %v309_v31 = vld [vmem:[%s2095_s6 + $0x468] sm:$0xff] }
  0x7c   : > { %1303 = vst [vmem:[%s2128_s21 + $0x370] sm:$0xff] %v791_v33  ;;  %1304 = vst [vmem:[%s2128_s21 + $0x378] sm:$0xff] %v792_v37  ;;  %v821_v30 = vmul.f32 %v2107_v6, %v308_v27  ;;  %v310_v32 = vld [vmem:[%s2095_s6 + $0x470] sm:$0xff]  ;;  %v311_v33 = vld [vmem:[%s2095_s6 + $0x478] sm:$0xff]  ;;  %v822_v34 = vmul.f32 %v2107_v6, %v309_v31 }
  0x7d   : > { %1305 = vst [vmem:[%s2128_s21 + $0x380] sm:$0xff] %v793_v38  ;;  %1306 = vst [vmem:[%s2128_s21 + $0x388] sm:$0xff] %v794_v39  ;;  %v823_v35 = vmul.f32 %v2107_v6, %v310_v32  ;;  %v824_v36 = vmul.f32 %v2107_v6, %v311_v33  ;;  %v312_v37 = vld [vmem:[%s2095_s6 + $0x480] sm:$0xff]  ;;  %v313_v38 = vld [vmem:[%s2095_s6 + $0x488] sm:$0xff] }
  0x7e   : > { %1307 = vst [vmem:[%s2128_s21 + $0x390] sm:$0xff] %v795_v43  ;;  %1308 = vst [vmem:[%s2128_s21 + $0x398] sm:$0xff] %v796_v44  ;;  %v314_v39 = vld [vmem:[%s2095_s6 + $0x490] sm:$0xff]  ;;  %v825_v40 = vmul.f32 %v2107_v6, %v312_v37  ;;  %v826_v41 = vmul.f32 %v2107_v6, %v313_v38  ;;  %v315_v43 = vld [vmem:[%s2095_s6 + $0x498] sm:$0xff] }
  0x7f   : > { %1309 = vst [vmem:[%s2128_s21 + $0x3a0] sm:$0xff] %v797_v45  ;;  %1310 = vst [vmem:[%s2128_s21 + $0x3a8] sm:$0xff] %v798_v49  ;;  %v827_v42 = vmul.f32 %v2107_v6, %v314_v39  ;;  %v316_v44 = vld [vmem:[%s2095_s6 + $0x4a0] sm:$0xff]  ;;  %v317_v45 = vld [vmem:[%s2095_s6 + $0x4a8] sm:$0xff]  ;;  %v828_v46 = vmul.f32 %v2107_v6, %v315_v43 }
  0x80   : > { %1311 = vst [vmem:[%s2128_s21 + $0x3b0] sm:$0xff] %v799_v50  ;;  %1312 = vst [vmem:[%s2128_s21 + $0x3b8] sm:$0xff] %v800_v51  ;;  %v829_v47 = vmul.f32 %v2107_v6, %v316_v44  ;;  %v830_v48 = vmul.f32 %v2107_v6, %v317_v45  ;;  %v318_v49 = vld [vmem:[%s2095_s6 + $0x4b0] sm:$0xff]  ;;  %v319_v50 = vld [vmem:[%s2095_s6 + $0x4b8] sm:$0xff] }
  0x81   : > { %1313 = vst [vmem:[%s2128_s21 + $0x3c0] sm:$0xff] %v801_v55  ;;  %1314 = vst [vmem:[%s2128_s21 + $0x3c8] sm:$0xff] %v802_v56  ;;  %v320_v51 = vld [vmem:[%s2095_s6 + $0x4c0] sm:$0xff]  ;;  %v831_v52 = vmul.f32 %v2107_v6, %v318_v49  ;;  %v832_v53 = vmul.f32 %v2107_v6, %v319_v50  ;;  %v321_v55 = vld [vmem:[%s2095_s6 + $0x4c8] sm:$0xff] }
  0x82   : > { %1315 = vst [vmem:[%s2128_s21 + $0x3d0] sm:$0xff] %v803_v57  ;;  %1316 = vst [vmem:[%s2128_s21 + $0x3d8] sm:$0xff] %v804_v61  ;;  %v833_v54 = vmul.f32 %v2107_v6, %v320_v51  ;;  %v322_v56 = vld [vmem:[%s2095_s6 + $0x4d0] sm:$0xff]  ;;  %v323_v57 = vld [vmem:[%s2095_s6 + $0x4d8] sm:$0xff]  ;;  %v834_v58 = vmul.f32 %v2107_v6, %v321_v55 }
  0x83   : > { %1317 = vst [vmem:[%s2128_s21 + $0x3e0] sm:$0xff] %v805_v62  ;;  %1318 = vst [vmem:[%s2128_s21 + $0x3e8] sm:$0xff] %v806_v63  ;;  %v835_v59 = vmul.f32 %v2107_v6, %v322_v56  ;;  %v836_v60 = vmul.f32 %v2107_v6, %v323_v57  ;;  %v324_v61 = vld [vmem:[%s2095_s6 + $0x4e0] sm:$0xff]  ;;  %v325_v62 = vld [vmem:[%s2095_s6 + $0x4e8] sm:$0xff] }
  0x84   : > { %1319 = vst [vmem:[%s2128_s21 + $0x3f0] sm:$0xff] %v807_v3  ;;  %1320 = vst [vmem:[%s2128_s21 + $0x3f8] sm:$0xff] %v808_v4  ;;  %v326_v63 = vld [vmem:[%s2095_s6 + $0x4f0] sm:$0xff]  ;;  %v837_v0 = vmul.f32 %v2107_v6, %v324_v61  ;;  %v838_v1 = vmul.f32 %v2107_v6, %v325_v62  ;;  %v327_v3 = vld [vmem:[%s2095_s6 + $0x4f8] sm:$0xff] }
  0x85   : > { %1321 = vst [vmem:[%s2128_s21 + $0x400] sm:$0xff] %v809_v5  ;;  %1322 = vst [vmem:[%s2128_s21 + $0x408] sm:$0xff] %v810_v10  ;;  %v839_v2 = vmul.f32 %v2107_v6, %v326_v63  ;;  %v328_v4 = vld [vmem:[%s2095_s6 + $0x500] sm:$0xff]  ;;  %v329_v5 = vld [vmem:[%s2095_s6 + $0x508] sm:$0xff]  ;;  %v840_v7 = vmul.f32 %v2107_v6, %v327_v3 }
  0x86   : > { %1323 = vst [vmem:[%s2128_s21 + $0x410] sm:$0xff] %v811_v11  ;;  %1324 = vst [vmem:[%s2128_s21 + $0x418] sm:$0xff] %v812_v12  ;;  %v841_v8 = vmul.f32 %v2107_v6, %v328_v4  ;;  %v842_v9 = vmul.f32 %v2107_v6, %v329_v5  ;;  %v330_v10 = vld [vmem:[%s2095_s6 + $0x510] sm:$0xff]  ;;  %v331_v11 = vld [vmem:[%s2095_s6 + $0x518] sm:$0xff] }
  0x87   : > { %1325 = vst [vmem:[%s2128_s21 + $0x420] sm:$0xff] %v813_v16  ;;  %1326 = vst [vmem:[%s2128_s21 + $0x428] sm:$0xff] %v814_v17  ;;  %v332_v12 = vld [vmem:[%s2095_s6 + $0x520] sm:$0xff]  ;;  %v843_v13 = vmul.f32 %v2107_v6, %v330_v10  ;;  %v844_v14 = vmul.f32 %v2107_v6, %v331_v11  ;;  %v333_v16 = vld [vmem:[%s2095_s6 + $0x528] sm:$0xff] }
  0x88   : > { %1327 = vst [vmem:[%s2128_s21 + $0x430] sm:$0xff] %v815_v18  ;;  %1328 = vst [vmem:[%s2128_s21 + $0x438] sm:$0xff] %v816_v22  ;;  %v845_v15 = vmul.f32 %v2107_v6, %v332_v12  ;;  %v334_v17 = vld [vmem:[%s2095_s6 + $0x530] sm:$0xff]  ;;  %v335_v18 = vld [vmem:[%s2095_s6 + $0x538] sm:$0xff]  ;;  %v846_v19 = vmul.f32 %v2107_v6, %v333_v16 }
  0x89   : > { %1329 = vst [vmem:[%s2128_s21 + $0x440] sm:$0xff] %v817_v23  ;;  %1330 = vst [vmem:[%s2128_s21 + $0x448] sm:$0xff] %v818_v24  ;;  %v847_v20 = vmul.f32 %v2107_v6, %v334_v17  ;;  %v848_v21 = vmul.f32 %v2107_v6, %v335_v18  ;;  %v336_v22 = vld [vmem:[%s2095_s6 + $0x540] sm:$0xff]  ;;  %v337_v23 = vld [vmem:[%s2095_s6 + $0x548] sm:$0xff] }
  0x8a   : > { %1331 = vst [vmem:[%s2128_s21 + $0x450] sm:$0xff] %v819_v28  ;;  %1332 = vst [vmem:[%s2128_s21 + $0x458] sm:$0xff] %v820_v29  ;;  %v338_v24 = vld [vmem:[%s2095_s6 + $0x550] sm:$0xff]  ;;  %v849_v25 = vmul.f32 %v2107_v6, %v336_v22  ;;  %v850_v26 = vmul.f32 %v2107_v6, %v337_v23  ;;  %v339_v28 = vld [vmem:[%s2095_s6 + $0x558] sm:$0xff] }
  0x8b   : > { %1333 = vst [vmem:[%s2128_s21 + $0x460] sm:$0xff] %v821_v30  ;;  %1334 = vst [vmem:[%s2128_s21 + $0x468] sm:$0xff] %v822_v34  ;;  %v851_v27 = vmul.f32 %v2107_v6, %v338_v24  ;;  %v340_v29 = vld [vmem:[%s2095_s6 + $0x560] sm:$0xff]  ;;  %v341_v30 = vld [vmem:[%s2095_s6 + $0x568] sm:$0xff]  ;;  %v852_v31 = vmul.f32 %v2107_v6, %v339_v28 }
  0x8c   : > { %1335 = vst [vmem:[%s2128_s21 + $0x470] sm:$0xff] %v823_v35  ;;  %1336 = vst [vmem:[%s2128_s21 + $0x478] sm:$0xff] %v824_v36  ;;  %v853_v32 = vmul.f32 %v2107_v6, %v340_v29  ;;  %v854_v33 = vmul.f32 %v2107_v6, %v341_v30  ;;  %v342_v34 = vld [vmem:[%s2095_s6 + $0x570] sm:$0xff]  ;;  %v343_v35 = vld [vmem:[%s2095_s6 + $0x578] sm:$0xff] }
  0x8d   : > { %1337 = vst [vmem:[%s2128_s21 + $0x480] sm:$0xff] %v825_v40  ;;  %1338 = vst [vmem:[%s2128_s21 + $0x488] sm:$0xff] %v826_v41  ;;  %v344_v36 = vld [vmem:[%s2095_s6 + $0x580] sm:$0xff]  ;;  %v855_v37 = vmul.f32 %v2107_v6, %v342_v34  ;;  %v856_v38 = vmul.f32 %v2107_v6, %v343_v35  ;;  %v345_v40 = vld [vmem:[%s2095_s6 + $0x588] sm:$0xff] }
  0x8e   : > { %1339 = vst [vmem:[%s2128_s21 + $0x490] sm:$0xff] %v827_v42  ;;  %1340 = vst [vmem:[%s2128_s21 + $0x498] sm:$0xff] %v828_v46  ;;  %v857_v39 = vmul.f32 %v2107_v6, %v344_v36  ;;  %v346_v41 = vld [vmem:[%s2095_s6 + $0x590] sm:$0xff]  ;;  %v347_v42 = vld [vmem:[%s2095_s6 + $0x598] sm:$0xff]  ;;  %v858_v43 = vmul.f32 %v2107_v6, %v345_v40 }
  0x8f   : > { %1341 = vst [vmem:[%s2128_s21 + $0x4a0] sm:$0xff] %v829_v47  ;;  %1342 = vst [vmem:[%s2128_s21 + $0x4a8] sm:$0xff] %v830_v48  ;;  %v859_v44 = vmul.f32 %v2107_v6, %v346_v41  ;;  %v860_v45 = vmul.f32 %v2107_v6, %v347_v42  ;;  %v348_v46 = vld [vmem:[%s2095_s6 + $0x5a0] sm:$0xff]  ;;  %v349_v47 = vld [vmem:[%s2095_s6 + $0x5a8] sm:$0xff] }
  0x90   : > { %1343 = vst [vmem:[%s2128_s21 + $0x4b0] sm:$0xff] %v831_v52  ;;  %1344 = vst [vmem:[%s2128_s21 + $0x4b8] sm:$0xff] %v832_v53  ;;  %v350_v48 = vld [vmem:[%s2095_s6 + $0x5b0] sm:$0xff]  ;;  %v861_v49 = vmul.f32 %v2107_v6, %v348_v46  ;;  %v862_v50 = vmul.f32 %v2107_v6, %v349_v47  ;;  %v351_v52 = vld [vmem:[%s2095_s6 + $0x5b8] sm:$0xff] }
  0x91   : > { %1345 = vst [vmem:[%s2128_s21 + $0x4c0] sm:$0xff] %v833_v54  ;;  %1346 = vst [vmem:[%s2128_s21 + $0x4c8] sm:$0xff] %v834_v58  ;;  %v863_v51 = vmul.f32 %v2107_v6, %v350_v48  ;;  %v352_v53 = vld [vmem:[%s2095_s6 + $0x5c0] sm:$0xff]  ;;  %v353_v54 = vld [vmem:[%s2095_s6 + $0x5c8] sm:$0xff]  ;;  %v864_v55 = vmul.f32 %v2107_v6, %v351_v52 }
  0x92   : > { %1347 = vst [vmem:[%s2128_s21 + $0x4d0] sm:$0xff] %v835_v59  ;;  %1348 = vst [vmem:[%s2128_s21 + $0x4d8] sm:$0xff] %v836_v60  ;;  %v865_v56 = vmul.f32 %v2107_v6, %v352_v53  ;;  %v866_v57 = vmul.f32 %v2107_v6, %v353_v54  ;;  %v354_v58 = vld [vmem:[%s2095_s6 + $0x5d0] sm:$0xff]  ;;  %v355_v59 = vld [vmem:[%s2095_s6 + $0x5d8] sm:$0xff] }
  0x93   : > { %1349 = vst [vmem:[%s2128_s21 + $0x4e0] sm:$0xff] %v837_v0  ;;  %1350 = vst [vmem:[%s2128_s21 + $0x4e8] sm:$0xff] %v838_v1  ;;  %v356_v60 = vld [vmem:[%s2095_s6 + $0x5e0] sm:$0xff]  ;;  %v867_v61 = vmul.f32 %v2107_v6, %v354_v58  ;;  %v868_v62 = vmul.f32 %v2107_v6, %v355_v59  ;;  %v357_v0 = vld [vmem:[%s2095_s6 + $0x5e8] sm:$0xff] }
  0x94   : > { %1351 = vst [vmem:[%s2128_s21 + $0x4f0] sm:$0xff] %v839_v2  ;;  %1352 = vst [vmem:[%s2128_s21 + $0x4f8] sm:$0xff] %v840_v7  ;;  %v869_v63 = vmul.f32 %v2107_v6, %v356_v60  ;;  %v358_v1 = vld [vmem:[%s2095_s6 + $0x5f0] sm:$0xff]  ;;  %v359_v2 = vld [vmem:[%s2095_s6 + $0x5f8] sm:$0xff]  ;;  %v870_v3 = vmul.f32 %v2107_v6, %v357_v0 }
  0x95   : > { %1353 = vst [vmem:[%s2128_s21 + $0x500] sm:$0xff] %v841_v8  ;;  %1354 = vst [vmem:[%s2128_s21 + $0x508] sm:$0xff] %v842_v9  ;;  %v871_v4 = vmul.f32 %v2107_v6, %v358_v1  ;;  %v872_v5 = vmul.f32 %v2107_v6, %v359_v2  ;;  %v360_v7 = vld [vmem:[%s2095_s6 + $0x600] sm:$0xff]  ;;  %v361_v8 = vld [vmem:[%s2095_s6 + $0x608] sm:$0xff] }
  0x96   : > { %1355 = vst [vmem:[%s2128_s21 + $0x510] sm:$0xff] %v843_v13  ;;  %1356 = vst [vmem:[%s2128_s21 + $0x518] sm:$0xff] %v844_v14  ;;  %v362_v9 = vld [vmem:[%s2095_s6 + $0x610] sm:$0xff]  ;;  %v873_v10 = vmul.f32 %v2107_v6, %v360_v7  ;;  %v874_v11 = vmul.f32 %v2107_v6, %v361_v8  ;;  %v363_v13 = vld [vmem:[%s2095_s6 + $0x618] sm:$0xff] }
  0x97   : > { %1357 = vst [vmem:[%s2128_s21 + $0x520] sm:$0xff] %v845_v15  ;;  %1358 = vst [vmem:[%s2128_s21 + $0x528] sm:$0xff] %v846_v19  ;;  %v875_v12 = vmul.f32 %v2107_v6, %v362_v9  ;;  %v364_v14 = vld [vmem:[%s2095_s6 + $0x620] sm:$0xff]  ;;  %v365_v15 = vld [vmem:[%s2095_s6 + $0x628] sm:$0xff]  ;;  %v876_v16 = vmul.f32 %v2107_v6, %v363_v13 }
  0x98   : > { %1359 = vst [vmem:[%s2128_s21 + $0x530] sm:$0xff] %v847_v20  ;;  %1360 = vst [vmem:[%s2128_s21 + $0x538] sm:$0xff] %v848_v21  ;;  %v877_v17 = vmul.f32 %v2107_v6, %v364_v14  ;;  %v878_v18 = vmul.f32 %v2107_v6, %v365_v15  ;;  %v366_v19 = vld [vmem:[%s2095_s6 + $0x630] sm:$0xff]  ;;  %v367_v20 = vld [vmem:[%s2095_s6 + $0x638] sm:$0xff] }
  0x99   : > { %1361 = vst [vmem:[%s2128_s21 + $0x540] sm:$0xff] %v849_v25  ;;  %1362 = vst [vmem:[%s2128_s21 + $0x548] sm:$0xff] %v850_v26  ;;  %v368_v21 = vld [vmem:[%s2095_s6 + $0x640] sm:$0xff]  ;;  %v879_v22 = vmul.f32 %v2107_v6, %v366_v19  ;;  %v880_v23 = vmul.f32 %v2107_v6, %v367_v20  ;;  %v369_v25 = vld [vmem:[%s2095_s6 + $0x648] sm:$0xff] }
  0x9a   : > { %1363 = vst [vmem:[%s2128_s21 + $0x550] sm:$0xff] %v851_v27  ;;  %1364 = vst [vmem:[%s2128_s21 + $0x558] sm:$0xff] %v852_v31  ;;  %v881_v24 = vmul.f32 %v2107_v6, %v368_v21  ;;  %v370_v26 = vld [vmem:[%s2095_s6 + $0x650] sm:$0xff]  ;;  %v371_v27 = vld [vmem:[%s2095_s6 + $0x658] sm:$0xff]  ;;  %v882_v28 = vmul.f32 %v2107_v6, %v369_v25 }
  0x9b   : > { %1365 = vst [vmem:[%s2128_s21 + $0x560] sm:$0xff] %v853_v32  ;;  %1366 = vst [vmem:[%s2128_s21 + $0x568] sm:$0xff] %v854_v33  ;;  %v883_v29 = vmul.f32 %v2107_v6, %v370_v26  ;;  %v884_v30 = vmul.f32 %v2107_v6, %v371_v27  ;;  %v372_v31 = vld [vmem:[%s2095_s6 + $0x660] sm:$0xff]  ;;  %v373_v32 = vld [vmem:[%s2095_s6 + $0x668] sm:$0xff] }
  0x9c   : > { %1367 = vst [vmem:[%s2128_s21 + $0x570] sm:$0xff] %v855_v37  ;;  %1368 = vst [vmem:[%s2128_s21 + $0x578] sm:$0xff] %v856_v38  ;;  %v374_v33 = vld [vmem:[%s2095_s6 + $0x670] sm:$0xff]  ;;  %v885_v34 = vmul.f32 %v2107_v6, %v372_v31  ;;  %v886_v35 = vmul.f32 %v2107_v6, %v373_v32  ;;  %v375_v37 = vld [vmem:[%s2095_s6 + $0x678] sm:$0xff] }
  0x9d   : > { %1369 = vst [vmem:[%s2128_s21 + $0x580] sm:$0xff] %v857_v39  ;;  %1370 = vst [vmem:[%s2128_s21 + $0x588] sm:$0xff] %v858_v43  ;;  %v887_v36 = vmul.f32 %v2107_v6, %v374_v33  ;;  %v376_v38 = vld [vmem:[%s2095_s6 + $0x680] sm:$0xff]  ;;  %v377_v39 = vld [vmem:[%s2095_s6 + $0x688] sm:$0xff]  ;;  %v888_v40 = vmul.f32 %v2107_v6, %v375_v37 }
  0x9e   : > { %1371 = vst [vmem:[%s2128_s21 + $0x590] sm:$0xff] %v859_v44  ;;  %1372 = vst [vmem:[%s2128_s21 + $0x598] sm:$0xff] %v860_v45  ;;  %v889_v41 = vmul.f32 %v2107_v6, %v376_v38  ;;  %v890_v42 = vmul.f32 %v2107_v6, %v377_v39  ;;  %v378_v43 = vld [vmem:[%s2095_s6 + $0x690] sm:$0xff]  ;;  %v379_v44 = vld [vmem:[%s2095_s6 + $0x698] sm:$0xff] }
  0x9f   : > { %1373 = vst [vmem:[%s2128_s21 + $0x5a0] sm:$0xff] %v861_v49  ;;  %1374 = vst [vmem:[%s2128_s21 + $0x5a8] sm:$0xff] %v862_v50  ;;  %v380_v45 = vld [vmem:[%s2095_s6 + $0x6a0] sm:$0xff]  ;;  %v891_v46 = vmul.f32 %v2107_v6, %v378_v43  ;;  %v892_v47 = vmul.f32 %v2107_v6, %v379_v44  ;;  %v381_v49 = vld [vmem:[%s2095_s6 + $0x6a8] sm:$0xff] }
  0xa0   : > { %1375 = vst [vmem:[%s2128_s21 + $0x5b0] sm:$0xff] %v863_v51  ;;  %1376 = vst [vmem:[%s2128_s21 + $0x5b8] sm:$0xff] %v864_v55  ;;  %v893_v48 = vmul.f32 %v2107_v6, %v380_v45  ;;  %v382_v50 = vld [vmem:[%s2095_s6 + $0x6b0] sm:$0xff]  ;;  %v383_v51 = vld [vmem:[%s2095_s6 + $0x6b8] sm:$0xff]  ;;  %v894_v52 = vmul.f32 %v2107_v6, %v381_v49 }
  0xa1   : > { %1377 = vst [vmem:[%s2128_s21 + $0x5c0] sm:$0xff] %v865_v56  ;;  %1378 = vst [vmem:[%s2128_s21 + $0x5c8] sm:$0xff] %v866_v57  ;;  %v895_v53 = vmul.f32 %v2107_v6, %v382_v50  ;;  %v896_v54 = vmul.f32 %v2107_v6, %v383_v51  ;;  %v384_v55 = vld [vmem:[%s2095_s6 + $0x6c0] sm:$0xff]  ;;  %v385_v56 = vld [vmem:[%s2095_s6 + $0x6c8] sm:$0xff] }
  0xa2   : > { %1379 = vst [vmem:[%s2128_s21 + $0x5d0] sm:$0xff] %v867_v61  ;;  %1380 = vst [vmem:[%s2128_s21 + $0x5d8] sm:$0xff] %v868_v62  ;;  %v386_v57 = vld [vmem:[%s2095_s6 + $0x6d0] sm:$0xff]  ;;  %v897_v58 = vmul.f32 %v2107_v6, %v384_v55  ;;  %v898_v59 = vmul.f32 %v2107_v6, %v385_v56  ;;  %v387_v61 = vld [vmem:[%s2095_s6 + $0x6d8] sm:$0xff] }
  0xa3   : > { %1381 = vst [vmem:[%s2128_s21 + $0x5e0] sm:$0xff] %v869_v63  ;;  %1382 = vst [vmem:[%s2128_s21 + $0x5e8] sm:$0xff] %v870_v3  ;;  %v899_v60 = vmul.f32 %v2107_v6, %v386_v57  ;;  %v388_v62 = vld [vmem:[%s2095_s6 + $0x6e0] sm:$0xff]  ;;  %v389_v63 = vld [vmem:[%s2095_s6 + $0x6e8] sm:$0xff]  ;;  %v900_v0 = vmul.f32 %v2107_v6, %v387_v61 }
  0xa4   : > { %1383 = vst [vmem:[%s2128_s21 + $0x5f0] sm:$0xff] %v871_v4  ;;  %1384 = vst [vmem:[%s2128_s21 + $0x5f8] sm:$0xff] %v872_v5  ;;  %v901_v1 = vmul.f32 %v2107_v6, %v388_v62  ;;  %v902_v2 = vmul.f32 %v2107_v6, %v389_v63  ;;  %v390_v3 = vld [vmem:[%s2095_s6 + $0x6f0] sm:$0xff]  ;;  %v391_v4 = vld [vmem:[%s2095_s6 + $0x6f8] sm:$0xff] }
  0xa5   : > { %1385 = vst [vmem:[%s2128_s21 + $0x600] sm:$0xff] %v873_v10  ;;  %1386 = vst [vmem:[%s2128_s21 + $0x608] sm:$0xff] %v874_v11  ;;  %v392_v5 = vld [vmem:[%s2095_s6 + $0x700] sm:$0xff]  ;;  %v903_v7 = vmul.f32 %v2107_v6, %v390_v3  ;;  %v904_v8 = vmul.f32 %v2107_v6, %v391_v4  ;;  %v393_v10 = vld [vmem:[%s2095_s6 + $0x708] sm:$0xff] }
  0xa6   : > { %1387 = vst [vmem:[%s2128_s21 + $0x610] sm:$0xff] %v875_v12  ;;  %1388 = vst [vmem:[%s2128_s21 + $0x618] sm:$0xff] %v876_v16  ;;  %v905_v9 = vmul.f32 %v2107_v6, %v392_v5  ;;  %v394_v11 = vld [vmem:[%s2095_s6 + $0x710] sm:$0xff]  ;;  %v395_v12 = vld [vmem:[%s2095_s6 + $0x718] sm:$0xff]  ;;  %v906_v13 = vmul.f32 %v2107_v6, %v393_v10 }
  0xa7   : > { %1389 = vst [vmem:[%s2128_s21 + $0x620] sm:$0xff] %v877_v17  ;;  %1390 = vst [vmem:[%s2128_s21 + $0x628] sm:$0xff] %v878_v18  ;;  %v907_v14 = vmul.f32 %v2107_v6, %v394_v11  ;;  %v908_v15 = vmul.f32 %v2107_v6, %v395_v12  ;;  %v396_v16 = vld [vmem:[%s2095_s6 + $0x720] sm:$0xff]  ;;  %v397_v17 = vld [vmem:[%s2095_s6 + $0x728] sm:$0xff] }
  0xa8   : > { %1391 = vst [vmem:[%s2128_s21 + $0x630] sm:$0xff] %v879_v22  ;;  %1392 = vst [vmem:[%s2128_s21 + $0x638] sm:$0xff] %v880_v23  ;;  %v398_v18 = vld [vmem:[%s2095_s6 + $0x730] sm:$0xff]  ;;  %v909_v19 = vmul.f32 %v2107_v6, %v396_v16  ;;  %v910_v20 = vmul.f32 %v2107_v6, %v397_v17  ;;  %v399_v22 = vld [vmem:[%s2095_s6 + $0x738] sm:$0xff] }
  0xa9   : > { %1393 = vst [vmem:[%s2128_s21 + $0x640] sm:$0xff] %v881_v24  ;;  %1394 = vst [vmem:[%s2128_s21 + $0x648] sm:$0xff] %v882_v28  ;;  %v911_v21 = vmul.f32 %v2107_v6, %v398_v18  ;;  %v400_v23 = vld [vmem:[%s2095_s6 + $0x740] sm:$0xff]  ;;  %v401_v24 = vld [vmem:[%s2095_s6 + $0x748] sm:$0xff]  ;;  %v912_v25 = vmul.f32 %v2107_v6, %v399_v22 }
  0xaa   : > { %1395 = vst [vmem:[%s2128_s21 + $0x650] sm:$0xff] %v883_v29  ;;  %1396 = vst [vmem:[%s2128_s21 + $0x658] sm:$0xff] %v884_v30  ;;  %v913_v26 = vmul.f32 %v2107_v6, %v400_v23  ;;  %v914_v27 = vmul.f32 %v2107_v6, %v401_v24  ;;  %v402_v28 = vld [vmem:[%s2095_s6 + $0x750] sm:$0xff]  ;;  %v403_v29 = vld [vmem:[%s2095_s6 + $0x758] sm:$0xff] }
  0xab   : > { %1397 = vst [vmem:[%s2128_s21 + $0x660] sm:$0xff] %v885_v34  ;;  %1398 = vst [vmem:[%s2128_s21 + $0x668] sm:$0xff] %v886_v35  ;;  %v404_v30 = vld [vmem:[%s2095_s6 + $0x760] sm:$0xff]  ;;  %v915_v31 = vmul.f32 %v2107_v6, %v402_v28  ;;  %v916_v32 = vmul.f32 %v2107_v6, %v403_v29  ;;  %v405_v34 = vld [vmem:[%s2095_s6 + $0x768] sm:$0xff] }
  0xac   : > { %1399 = vst [vmem:[%s2128_s21 + $0x670] sm:$0xff] %v887_v36  ;;  %1400 = vst [vmem:[%s2128_s21 + $0x678] sm:$0xff] %v888_v40  ;;  %v917_v33 = vmul.f32 %v2107_v6, %v404_v30  ;;  %v406_v35 = vld [vmem:[%s2095_s6 + $0x770] sm:$0xff]  ;;  %v407_v36 = vld [vmem:[%s2095_s6 + $0x778] sm:$0xff]  ;;  %v918_v37 = vmul.f32 %v2107_v6, %v405_v34 }
  0xad   : > { %1401 = vst [vmem:[%s2128_s21 + $0x680] sm:$0xff] %v889_v41  ;;  %1402 = vst [vmem:[%s2128_s21 + $0x688] sm:$0xff] %v890_v42  ;;  %v919_v38 = vmul.f32 %v2107_v6, %v406_v35  ;;  %v920_v39 = vmul.f32 %v2107_v6, %v407_v36  ;;  %v408_v40 = vld [vmem:[%s2095_s6 + $0x780] sm:$0xff]  ;;  %v409_v41 = vld [vmem:[%s2095_s6 + $0x788] sm:$0xff] }
  0xae   : > { %1403 = vst [vmem:[%s2128_s21 + $0x690] sm:$0xff] %v891_v46  ;;  %1404 = vst [vmem:[%s2128_s21 + $0x698] sm:$0xff] %v892_v47  ;;  %v410_v42 = vld [vmem:[%s2095_s6 + $0x790] sm:$0xff]  ;;  %v921_v43 = vmul.f32 %v2107_v6, %v408_v40  ;;  %v922_v44 = vmul.f32 %v2107_v6, %v409_v41  ;;  %v411_v46 = vld [vmem:[%s2095_s6 + $0x798] sm:$0xff] }
  0xaf   : > { %1405 = vst [vmem:[%s2128_s21 + $0x6a0] sm:$0xff] %v893_v48  ;;  %1406 = vst [vmem:[%s2128_s21 + $0x6a8] sm:$0xff] %v894_v52  ;;  %v923_v45 = vmul.f32 %v2107_v6, %v410_v42  ;;  %v412_v47 = vld [vmem:[%s2095_s6 + $0x7a0] sm:$0xff]  ;;  %v413_v48 = vld [vmem:[%s2095_s6 + $0x7a8] sm:$0xff]  ;;  %v924_v49 = vmul.f32 %v2107_v6, %v411_v46 }
  0xb0   : > { %1407 = vst [vmem:[%s2128_s21 + $0x6b0] sm:$0xff] %v895_v53  ;;  %1408 = vst [vmem:[%s2128_s21 + $0x6b8] sm:$0xff] %v896_v54  ;;  %v925_v50 = vmul.f32 %v2107_v6, %v412_v47  ;;  %v926_v51 = vmul.f32 %v2107_v6, %v413_v48  ;;  %v414_v52 = vld [vmem:[%s2095_s6 + $0x7b0] sm:$0xff]  ;;  %v415_v53 = vld [vmem:[%s2095_s6 + $0x7b8] sm:$0xff] }
  0xb1   : > { %1409 = vst [vmem:[%s2128_s21 + $0x6c0] sm:$0xff] %v897_v58  ;;  %1410 = vst [vmem:[%s2128_s21 + $0x6c8] sm:$0xff] %v898_v59  ;;  %v416_v54 = vld [vmem:[%s2095_s6 + $0x7c0] sm:$0xff]  ;;  %v927_v55 = vmul.f32 %v2107_v6, %v414_v52  ;;  %v928_v56 = vmul.f32 %v2107_v6, %v415_v53  ;;  %v417_v58 = vld [vmem:[%s2095_s6 + $0x7c8] sm:$0xff] }
  0xb2   : > { %1411 = vst [vmem:[%s2128_s21 + $0x6d0] sm:$0xff] %v899_v60  ;;  %1412 = vst [vmem:[%s2128_s21 + $0x6d8] sm:$0xff] %v900_v0  ;;  %v929_v57 = vmul.f32 %v2107_v6, %v416_v54  ;;  %v418_v59 = vld [vmem:[%s2095_s6 + $0x7d0] sm:$0xff]  ;;  %v419_v60 = vld [vmem:[%s2095_s6 + $0x7d8] sm:$0xff]  ;;  %v930_v61 = vmul.f32 %v2107_v6, %v417_v58 }
  0xb3   : > { %1413 = vst [vmem:[%s2128_s21 + $0x6e0] sm:$0xff] %v901_v1  ;;  %1414 = vst [vmem:[%s2128_s21 + $0x6e8] sm:$0xff] %v902_v2  ;;  %v931_v62 = vmul.f32 %v2107_v6, %v418_v59  ;;  %v932_v63 = vmul.f32 %v2107_v6, %v419_v60  ;;  %v420_v0 = vld [vmem:[%s2095_s6 + $0x7e0] sm:$0xff]  ;;  %v421_v1 = vld [vmem:[%s2095_s6 + $0x7e8] sm:$0xff] }
  0xb4   : > { %1415 = vst [vmem:[%s2128_s21 + $0x6f0] sm:$0xff] %v903_v7  ;;  %1416 = vst [vmem:[%s2128_s21 + $0x6f8] sm:$0xff] %v904_v8  ;;  %v422_v2 = vld [vmem:[%s2095_s6 + $0x7f0] sm:$0xff]  ;;  %v933_v3 = vmul.f32 %v2107_v6, %v420_v0  ;;  %v934_v4 = vmul.f32 %v2107_v6, %v421_v1  ;;  %v423_v7 = vld [vmem:[%s2095_s6 + $0x7f8] sm:$0xff] }
  0xb5   : > { %1417 = vst [vmem:[%s2128_s21 + $0x700] sm:$0xff] %v905_v9  ;;  %1418 = vst [vmem:[%s2128_s21 + $0x708] sm:$0xff] %v906_v13  ;;  %v935_v5 = vmul.f32 %v2107_v6, %v422_v2  ;;  %v424_v8 = vld [vmem:[%s2095_s6 + $0x800] sm:$0xff]  ;;  %v425_v9 = vld [vmem:[%s2095_s6 + $0x808] sm:$0xff]  ;;  %v936_v10 = vmul.f32 %v2107_v6, %v423_v7 }
  0xb6   : > { %1419 = vst [vmem:[%s2128_s21 + $0x710] sm:$0xff] %v907_v14  ;;  %1420 = vst [vmem:[%s2128_s21 + $0x718] sm:$0xff] %v908_v15  ;;  %v937_v11 = vmul.f32 %v2107_v6, %v424_v8  ;;  %v938_v12 = vmul.f32 %v2107_v6, %v425_v9  ;;  %v426_v13 = vld [vmem:[%s2095_s6 + $0x810] sm:$0xff]  ;;  %v427_v14 = vld [vmem:[%s2095_s6 + $0x818] sm:$0xff] }
  0xb7   : > { %1421 = vst [vmem:[%s2128_s21 + $0x720] sm:$0xff] %v909_v19  ;;  %1422 = vst [vmem:[%s2128_s21 + $0x728] sm:$0xff] %v910_v20  ;;  %v428_v15 = vld [vmem:[%s2095_s6 + $0x820] sm:$0xff]  ;;  %v939_v16 = vmul.f32 %v2107_v6, %v426_v13  ;;  %v940_v17 = vmul.f32 %v2107_v6, %v427_v14  ;;  %v429_v19 = vld [vmem:[%s2095_s6 + $0x828] sm:$0xff] }
  0xb8   : > { %1423 = vst [vmem:[%s2128_s21 + $0x730] sm:$0xff] %v911_v21  ;;  %1424 = vst [vmem:[%s2128_s21 + $0x738] sm:$0xff] %v912_v25  ;;  %v941_v18 = vmul.f32 %v2107_v6, %v428_v15  ;;  %v430_v20 = vld [vmem:[%s2095_s6 + $0x830] sm:$0xff]  ;;  %v431_v21 = vld [vmem:[%s2095_s6 + $0x838] sm:$0xff]  ;;  %v942_v22 = vmul.f32 %v2107_v6, %v429_v19 }
  0xb9   : > { %1425 = vst [vmem:[%s2128_s21 + $0x740] sm:$0xff] %v913_v26  ;;  %1426 = vst [vmem:[%s2128_s21 + $0x748] sm:$0xff] %v914_v27  ;;  %v943_v23 = vmul.f32 %v2107_v6, %v430_v20  ;;  %v944_v24 = vmul.f32 %v2107_v6, %v431_v21  ;;  %v432_v25 = vld [vmem:[%s2095_s6 + $0x840] sm:$0xff]  ;;  %v433_v26 = vld [vmem:[%s2095_s6 + $0x848] sm:$0xff] }
  0xba   : > { %1427 = vst [vmem:[%s2128_s21 + $0x750] sm:$0xff] %v915_v31  ;;  %1428 = vst [vmem:[%s2128_s21 + $0x758] sm:$0xff] %v916_v32  ;;  %v434_v27 = vld [vmem:[%s2095_s6 + $0x850] sm:$0xff]  ;;  %v945_v28 = vmul.f32 %v2107_v6, %v432_v25  ;;  %v946_v29 = vmul.f32 %v2107_v6, %v433_v26  ;;  %v435_v31 = vld [vmem:[%s2095_s6 + $0x858] sm:$0xff] }
  0xbb   : > { %1429 = vst [vmem:[%s2128_s21 + $0x760] sm:$0xff] %v917_v33  ;;  %1430 = vst [vmem:[%s2128_s21 + $0x768] sm:$0xff] %v918_v37  ;;  %v947_v30 = vmul.f32 %v2107_v6, %v434_v27  ;;  %v436_v32 = vld [vmem:[%s2095_s6 + $0x860] sm:$0xff]  ;;  %v437_v33 = vld [vmem:[%s2095_s6 + $0x868] sm:$0xff]  ;;  %v948_v34 = vmul.f32 %v2107_v6, %v435_v31 }
  0xbc   : > { %1431 = vst [vmem:[%s2128_s21 + $0x770] sm:$0xff] %v919_v38  ;;  %1432 = vst [vmem:[%s2128_s21 + $0x778] sm:$0xff] %v920_v39  ;;  %v949_v35 = vmul.f32 %v2107_v6, %v436_v32  ;;  %v950_v36 = vmul.f32 %v2107_v6, %v437_v33  ;;  %v438_v37 = vld [vmem:[%s2095_s6 + $0x870] sm:$0xff]  ;;  %v439_v38 = vld [vmem:[%s2095_s6 + $0x878] sm:$0xff] }
  0xbd   : > { %1433 = vst [vmem:[%s2128_s21 + $0x780] sm:$0xff] %v921_v43  ;;  %1434 = vst [vmem:[%s2128_s21 + $0x788] sm:$0xff] %v922_v44  ;;  %v440_v39 = vld [vmem:[%s2095_s6 + $0x880] sm:$0xff]  ;;  %v951_v40 = vmul.f32 %v2107_v6, %v438_v37  ;;  %v952_v41 = vmul.f32 %v2107_v6, %v439_v38  ;;  %v441_v43 = vld [vmem:[%s2095_s6 + $0x888] sm:$0xff] }
  0xbe   : > { %1435 = vst [vmem:[%s2128_s21 + $0x790] sm:$0xff] %v923_v45  ;;  %1436 = vst [vmem:[%s2128_s21 + $0x798] sm:$0xff] %v924_v49  ;;  %v953_v42 = vmul.f32 %v2107_v6, %v440_v39  ;;  %v442_v44 = vld [vmem:[%s2095_s6 + $0x890] sm:$0xff]  ;;  %v443_v45 = vld [vmem:[%s2095_s6 + $0x898] sm:$0xff]  ;;  %v954_v46 = vmul.f32 %v2107_v6, %v441_v43 }
  0xbf   : > { %1437 = vst [vmem:[%s2128_s21 + $0x7a0] sm:$0xff] %v925_v50  ;;  %1438 = vst [vmem:[%s2128_s21 + $0x7a8] sm:$0xff] %v926_v51  ;;  %v955_v47 = vmul.f32 %v2107_v6, %v442_v44  ;;  %v956_v48 = vmul.f32 %v2107_v6, %v443_v45  ;;  %v444_v49 = vld [vmem:[%s2095_s6 + $0x8a0] sm:$0xff]  ;;  %v445_v50 = vld [vmem:[%s2095_s6 + $0x8a8] sm:$0xff] }
  0xc0   : > { %1439 = vst [vmem:[%s2128_s21 + $0x7b0] sm:$0xff] %v927_v55  ;;  %1440 = vst [vmem:[%s2128_s21 + $0x7b8] sm:$0xff] %v928_v56  ;;  %v446_v51 = vld [vmem:[%s2095_s6 + $0x8b0] sm:$0xff]  ;;  %v957_v52 = vmul.f32 %v2107_v6, %v444_v49  ;;  %v958_v53 = vmul.f32 %v2107_v6, %v445_v50  ;;  %v447_v55 = vld [vmem:[%s2095_s6 + $0x8b8] sm:$0xff] }
  0xc1   : > { %1441 = vst [vmem:[%s2128_s21 + $0x7c0] sm:$0xff] %v929_v57  ;;  %1442 = vst [vmem:[%s2128_s21 + $0x7c8] sm:$0xff] %v930_v61  ;;  %v959_v54 = vmul.f32 %v2107_v6, %v446_v51  ;;  %v448_v56 = vld [vmem:[%s2095_s6 + $0x8c0] sm:$0xff]  ;;  %v449_v57 = vld [vmem:[%s2095_s6 + $0x8c8] sm:$0xff]  ;;  %v960_v58 = vmul.f32 %v2107_v6, %v447_v55 }
  0xc2   : > { %1443 = vst [vmem:[%s2128_s21 + $0x7d0] sm:$0xff] %v931_v62  ;;  %1444 = vst [vmem:[%s2128_s21 + $0x7d8] sm:$0xff] %v932_v63  ;;  %v961_v59 = vmul.f32 %v2107_v6, %v448_v56  ;;  %v962_v60 = vmul.f32 %v2107_v6, %v449_v57  ;;  %v450_v61 = vld [vmem:[%s2095_s6 + $0x8d0] sm:$0xff]  ;;  %v451_v62 = vld [vmem:[%s2095_s6 + $0x8d8] sm:$0xff] }
  0xc3   : > { %1445 = vst [vmem:[%s2128_s21 + $0x7e0] sm:$0xff] %v933_v3  ;;  %1446 = vst [vmem:[%s2128_s21 + $0x7e8] sm:$0xff] %v934_v4  ;;  %v452_v63 = vld [vmem:[%s2095_s6 + $0x8e0] sm:$0xff]  ;;  %v963_v0 = vmul.f32 %v2107_v6, %v450_v61  ;;  %v964_v1 = vmul.f32 %v2107_v6, %v451_v62  ;;  %v453_v3 = vld [vmem:[%s2095_s6 + $0x8e8] sm:$0xff] }
  0xc4   : > { %1447 = vst [vmem:[%s2128_s21 + $0x7f0] sm:$0xff] %v935_v5  ;;  %1448 = vst [vmem:[%s2128_s21 + $0x7f8] sm:$0xff] %v936_v10  ;;  %v965_v2 = vmul.f32 %v2107_v6, %v452_v63  ;;  %v454_v4 = vld [vmem:[%s2095_s6 + $0x8f0] sm:$0xff]  ;;  %v455_v5 = vld [vmem:[%s2095_s6 + $0x8f8] sm:$0xff]  ;;  %v966_v7 = vmul.f32 %v2107_v6, %v453_v3 }
  0xc5   : > { %1449 = vst [vmem:[%s2128_s21 + $0x800] sm:$0xff] %v937_v11  ;;  %1450 = vst [vmem:[%s2128_s21 + $0x808] sm:$0xff] %v938_v12  ;;  %v967_v8 = vmul.f32 %v2107_v6, %v454_v4  ;;  %v968_v9 = vmul.f32 %v2107_v6, %v455_v5  ;;  %v456_v10 = vld [vmem:[%s2095_s6 + $0x900] sm:$0xff]  ;;  %v457_v11 = vld [vmem:[%s2095_s6 + $0x908] sm:$0xff] }
  0xc6   : > { %1451 = vst [vmem:[%s2128_s21 + $0x810] sm:$0xff] %v939_v16  ;;  %1452 = vst [vmem:[%s2128_s21 + $0x818] sm:$0xff] %v940_v17  ;;  %v458_v12 = vld [vmem:[%s2095_s6 + $0x910] sm:$0xff]  ;;  %v969_v13 = vmul.f32 %v2107_v6, %v456_v10  ;;  %v970_v14 = vmul.f32 %v2107_v6, %v457_v11  ;;  %v459_v16 = vld [vmem:[%s2095_s6 + $0x918] sm:$0xff] }
  0xc7   : > { %1453 = vst [vmem:[%s2128_s21 + $0x820] sm:$0xff] %v941_v18  ;;  %1454 = vst [vmem:[%s2128_s21 + $0x828] sm:$0xff] %v942_v22  ;;  %v971_v15 = vmul.f32 %v2107_v6, %v458_v12  ;;  %v460_v17 = vld [vmem:[%s2095_s6 + $0x920] sm:$0xff]  ;;  %v461_v18 = vld [vmem:[%s2095_s6 + $0x928] sm:$0xff]  ;;  %v972_v19 = vmul.f32 %v2107_v6, %v459_v16 }
  0xc8   : > { %1455 = vst [vmem:[%s2128_s21 + $0x830] sm:$0xff] %v943_v23  ;;  %1456 = vst [vmem:[%s2128_s21 + $0x838] sm:$0xff] %v944_v24  ;;  %v973_v20 = vmul.f32 %v2107_v6, %v460_v17  ;;  %v974_v21 = vmul.f32 %v2107_v6, %v461_v18  ;;  %v462_v22 = vld [vmem:[%s2095_s6 + $0x930] sm:$0xff]  ;;  %v463_v23 = vld [vmem:[%s2095_s6 + $0x938] sm:$0xff] }
  0xc9   : > { %1457 = vst [vmem:[%s2128_s21 + $0x840] sm:$0xff] %v945_v28  ;;  %1458 = vst [vmem:[%s2128_s21 + $0x848] sm:$0xff] %v946_v29  ;;  %v464_v24 = vld [vmem:[%s2095_s6 + $0x940] sm:$0xff]  ;;  %v975_v25 = vmul.f32 %v2107_v6, %v462_v22  ;;  %v976_v26 = vmul.f32 %v2107_v6, %v463_v23  ;;  %v465_v28 = vld [vmem:[%s2095_s6 + $0x948] sm:$0xff] }
  0xca   : > { %1459 = vst [vmem:[%s2128_s21 + $0x850] sm:$0xff] %v947_v30  ;;  %1460 = vst [vmem:[%s2128_s21 + $0x858] sm:$0xff] %v948_v34  ;;  %v977_v27 = vmul.f32 %v2107_v6, %v464_v24  ;;  %v466_v29 = vld [vmem:[%s2095_s6 + $0x950] sm:$0xff]  ;;  %v467_v30 = vld [vmem:[%s2095_s6 + $0x958] sm:$0xff]  ;;  %v978_v31 = vmul.f32 %v2107_v6, %v465_v28 }
  0xcb   : > { %1461 = vst [vmem:[%s2128_s21 + $0x860] sm:$0xff] %v949_v35  ;;  %1462 = vst [vmem:[%s2128_s21 + $0x868] sm:$0xff] %v950_v36  ;;  %v979_v32 = vmul.f32 %v2107_v6, %v466_v29  ;;  %v980_v33 = vmul.f32 %v2107_v6, %v467_v30  ;;  %v468_v34 = vld [vmem:[%s2095_s6 + $0x960] sm:$0xff]  ;;  %v469_v35 = vld [vmem:[%s2095_s6 + $0x968] sm:$0xff] }
  0xcc   : > { %1463 = vst [vmem:[%s2128_s21 + $0x870] sm:$0xff] %v951_v40  ;;  %1464 = vst [vmem:[%s2128_s21 + $0x878] sm:$0xff] %v952_v41  ;;  %v470_v36 = vld [vmem:[%s2095_s6 + $0x970] sm:$0xff]  ;;  %v981_v37 = vmul.f32 %v2107_v6, %v468_v34  ;;  %v982_v38 = vmul.f32 %v2107_v6, %v469_v35  ;;  %v471_v40 = vld [vmem:[%s2095_s6 + $0x978] sm:$0xff] }
  0xcd   : > { %1465 = vst [vmem:[%s2128_s21 + $0x880] sm:$0xff] %v953_v42  ;;  %1466 = vst [vmem:[%s2128_s21 + $0x888] sm:$0xff] %v954_v46  ;;  %v983_v39 = vmul.f32 %v2107_v6, %v470_v36  ;;  %v472_v41 = vld [vmem:[%s2095_s6 + $0x980] sm:$0xff]  ;;  %v473_v42 = vld [vmem:[%s2095_s6 + $0x988] sm:$0xff]  ;;  %v984_v43 = vmul.f32 %v2107_v6, %v471_v40 }
  0xce   : > { %1467 = vst [vmem:[%s2128_s21 + $0x890] sm:$0xff] %v955_v47  ;;  %1468 = vst [vmem:[%s2128_s21 + $0x898] sm:$0xff] %v956_v48  ;;  %v985_v44 = vmul.f32 %v2107_v6, %v472_v41  ;;  %v986_v45 = vmul.f32 %v2107_v6, %v473_v42  ;;  %v474_v46 = vld [vmem:[%s2095_s6 + $0x990] sm:$0xff]  ;;  %v475_v47 = vld [vmem:[%s2095_s6 + $0x998] sm:$0xff] }
  0xcf   : > { %1469 = vst [vmem:[%s2128_s21 + $0x8a0] sm:$0xff] %v957_v52  ;;  %1470 = vst [vmem:[%s2128_s21 + $0x8a8] sm:$0xff] %v958_v53  ;;  %v476_v48 = vld [vmem:[%s2095_s6 + $0x9a0] sm:$0xff]  ;;  %v987_v49 = vmul.f32 %v2107_v6, %v474_v46  ;;  %v988_v50 = vmul.f32 %v2107_v6, %v475_v47  ;;  %v477_v52 = vld [vmem:[%s2095_s6 + $0x9a8] sm:$0xff] }
  0xd0   : > { %1471 = vst [vmem:[%s2128_s21 + $0x8b0] sm:$0xff] %v959_v54  ;;  %1472 = vst [vmem:[%s2128_s21 + $0x8b8] sm:$0xff] %v960_v58  ;;  %v989_v51 = vmul.f32 %v2107_v6, %v476_v48  ;;  %v478_v53 = vld [vmem:[%s2095_s6 + $0x9b0] sm:$0xff]  ;;  %v479_v54 = vld [vmem:[%s2095_s6 + $0x9b8] sm:$0xff]  ;;  %v990_v55 = vmul.f32 %v2107_v6, %v477_v52 }
  0xd1   : > { %1473 = vst [vmem:[%s2128_s21 + $0x8c0] sm:$0xff] %v961_v59  ;;  %1474 = vst [vmem:[%s2128_s21 + $0x8c8] sm:$0xff] %v962_v60  ;;  %v991_v56 = vmul.f32 %v2107_v6, %v478_v53  ;;  %v992_v57 = vmul.f32 %v2107_v6, %v479_v54  ;;  %v480_v58 = vld [vmem:[%s2095_s6 + $0x9c0] sm:$0xff]  ;;  %v481_v59 = vld [vmem:[%s2095_s6 + $0x9c8] sm:$0xff] }
  0xd2   : > { %1475 = vst [vmem:[%s2128_s21 + $0x8d0] sm:$0xff] %v963_v0  ;;  %1476 = vst [vmem:[%s2128_s21 + $0x8d8] sm:$0xff] %v964_v1  ;;  %v482_v60 = vld [vmem:[%s2095_s6 + $0x9d0] sm:$0xff]  ;;  %v993_v61 = vmul.f32 %v2107_v6, %v480_v58  ;;  %v994_v62 = vmul.f32 %v2107_v6, %v481_v59  ;;  %v483_v0 = vld [vmem:[%s2095_s6 + $0x9d8] sm:$0xff] }
  0xd3   : > { %1477 = vst [vmem:[%s2128_s21 + $0x8e0] sm:$0xff] %v965_v2  ;;  %1478 = vst [vmem:[%s2128_s21 + $0x8e8] sm:$0xff] %v966_v7  ;;  %v995_v63 = vmul.f32 %v2107_v6, %v482_v60  ;;  %v484_v1 = vld [vmem:[%s2095_s6 + $0x9e0] sm:$0xff]  ;;  %v485_v2 = vld [vmem:[%s2095_s6 + $0x9e8] sm:$0xff]  ;;  %v996_v3 = vmul.f32 %v2107_v6, %v483_v0 }
  0xd4   : > { %1479 = vst [vmem:[%s2128_s21 + $0x8f0] sm:$0xff] %v967_v8  ;;  %1480 = vst [vmem:[%s2128_s21 + $0x8f8] sm:$0xff] %v968_v9  ;;  %v997_v4 = vmul.f32 %v2107_v6, %v484_v1  ;;  %v998_v5 = vmul.f32 %v2107_v6, %v485_v2  ;;  %v486_v7 = vld [vmem:[%s2095_s6 + $0x9f0] sm:$0xff]  ;;  %v487_v8 = vld [vmem:[%s2095_s6 + $0x9f8] sm:$0xff] }
  0xd5   : > { %1481 = vst [vmem:[%s2128_s21 + $0x900] sm:$0xff] %v969_v13  ;;  %1482 = vst [vmem:[%s2128_s21 + $0x908] sm:$0xff] %v970_v14  ;;  %v488_v9 = vld [vmem:[%s2095_s6 + $0xa00] sm:$0xff]  ;;  %v999_v10 = vmul.f32 %v2107_v6, %v486_v7  ;;  %v1000_v11 = vmul.f32 %v2107_v6, %v487_v8  ;;  %v489_v13 = vld [vmem:[%s2095_s6 + $0xa08] sm:$0xff] }
  0xd6   : > { %1483 = vst [vmem:[%s2128_s21 + $0x910] sm:$0xff] %v971_v15  ;;  %1484 = vst [vmem:[%s2128_s21 + $0x918] sm:$0xff] %v972_v19  ;;  %v1001_v12 = vmul.f32 %v2107_v6, %v488_v9  ;;  %v490_v14 = vld [vmem:[%s2095_s6 + $0xa10] sm:$0xff]  ;;  %v491_v15 = vld [vmem:[%s2095_s6 + $0xa18] sm:$0xff]  ;;  %v1002_v16 = vmul.f32 %v2107_v6, %v489_v13 }
  0xd7   : > { %1485 = vst [vmem:[%s2128_s21 + $0x920] sm:$0xff] %v973_v20  ;;  %1486 = vst [vmem:[%s2128_s21 + $0x928] sm:$0xff] %v974_v21  ;;  %v1003_v17 = vmul.f32 %v2107_v6, %v490_v14  ;;  %v1004_v18 = vmul.f32 %v2107_v6, %v491_v15  ;;  %v492_v19 = vld [vmem:[%s2095_s6 + $0xa20] sm:$0xff]  ;;  %v493_v20 = vld [vmem:[%s2095_s6 + $0xa28] sm:$0xff] }
  0xd8   : > { %1487 = vst [vmem:[%s2128_s21 + $0x930] sm:$0xff] %v975_v25  ;;  %1488 = vst [vmem:[%s2128_s21 + $0x938] sm:$0xff] %v976_v26  ;;  %v494_v21 = vld [vmem:[%s2095_s6 + $0xa30] sm:$0xff]  ;;  %v1005_v22 = vmul.f32 %v2107_v6, %v492_v19  ;;  %v1006_v23 = vmul.f32 %v2107_v6, %v493_v20  ;;  %v495_v25 = vld [vmem:[%s2095_s6 + $0xa38] sm:$0xff] }
  0xd9   : > { %1489 = vst [vmem:[%s2128_s21 + $0x940] sm:$0xff] %v977_v27  ;;  %1490 = vst [vmem:[%s2128_s21 + $0x948] sm:$0xff] %v978_v31  ;;  %v1007_v24 = vmul.f32 %v2107_v6, %v494_v21  ;;  %v496_v26 = vld [vmem:[%s2095_s6 + $0xa40] sm:$0xff]  ;;  %v497_v27 = vld [vmem:[%s2095_s6 + $0xa48] sm:$0xff]  ;;  %v1008_v28 = vmul.f32 %v2107_v6, %v495_v25 }
  0xda   : > { %1491 = vst [vmem:[%s2128_s21 + $0x950] sm:$0xff] %v979_v32  ;;  %1492 = vst [vmem:[%s2128_s21 + $0x958] sm:$0xff] %v980_v33  ;;  %v1009_v29 = vmul.f32 %v2107_v6, %v496_v26  ;;  %v1010_v30 = vmul.f32 %v2107_v6, %v497_v27  ;;  %v498_v31 = vld [vmem:[%s2095_s6 + $0xa50] sm:$0xff]  ;;  %v499_v32 = vld [vmem:[%s2095_s6 + $0xa58] sm:$0xff] }
  0xdb   : > { %1493 = vst [vmem:[%s2128_s21 + $0x960] sm:$0xff] %v981_v37  ;;  %1494 = vst [vmem:[%s2128_s21 + $0x968] sm:$0xff] %v982_v38  ;;  %v500_v33 = vld [vmem:[%s2095_s6 + $0xa60] sm:$0xff]  ;;  %v1011_v34 = vmul.f32 %v2107_v6, %v498_v31  ;;  %v1012_v35 = vmul.f32 %v2107_v6, %v499_v32  ;;  %v501_v37 = vld [vmem:[%s2095_s6 + $0xa68] sm:$0xff] }
  0xdc   : > { %1495 = vst [vmem:[%s2128_s21 + $0x970] sm:$0xff] %v983_v39  ;;  %1496 = vst [vmem:[%s2128_s21 + $0x978] sm:$0xff] %v984_v43  ;;  %v1013_v36 = vmul.f32 %v2107_v6, %v500_v33  ;;  %v502_v38 = vld [vmem:[%s2095_s6 + $0xa70] sm:$0xff]  ;;  %v503_v39 = vld [vmem:[%s2095_s6 + $0xa78] sm:$0xff]  ;;  %v1014_v40 = vmul.f32 %v2107_v6, %v501_v37 }
  0xdd   : > { %1497 = vst [vmem:[%s2128_s21 + $0x980] sm:$0xff] %v985_v44  ;;  %1498 = vst [vmem:[%s2128_s21 + $0x988] sm:$0xff] %v986_v45  ;;  %v1015_v41 = vmul.f32 %v2107_v6, %v502_v38  ;;  %v1016_v42 = vmul.f32 %v2107_v6, %v503_v39  ;;  %v504_v43 = vld [vmem:[%s2095_s6 + $0xa80] sm:$0xff]  ;;  %v505_v44 = vld [vmem:[%s2095_s6 + $0xa88] sm:$0xff] }
  0xde   : > { %1499 = vst [vmem:[%s2128_s21 + $0x990] sm:$0xff] %v987_v49  ;;  %1500 = vst [vmem:[%s2128_s21 + $0x998] sm:$0xff] %v988_v50  ;;  %v506_v45 = vld [vmem:[%s2095_s6 + $0xa90] sm:$0xff]  ;;  %v1017_v46 = vmul.f32 %v2107_v6, %v504_v43  ;;  %v1018_v47 = vmul.f32 %v2107_v6, %v505_v44  ;;  %v507_v49 = vld [vmem:[%s2095_s6 + $0xa98] sm:$0xff] }
  0xdf   : > { %1501 = vst [vmem:[%s2128_s21 + $0x9a0] sm:$0xff] %v989_v51  ;;  %1502 = vst [vmem:[%s2128_s21 + $0x9a8] sm:$0xff] %v990_v55  ;;  %v1019_v48 = vmul.f32 %v2107_v6, %v506_v45  ;;  %v508_v50 = vld [vmem:[%s2095_s6 + $0xaa0] sm:$0xff]  ;;  %v509_v51 = vld [vmem:[%s2095_s6 + $0xaa8] sm:$0xff]  ;;  %v1020_v52 = vmul.f32 %v2107_v6, %v507_v49 }
  0xe0   : > { %1503 = vst [vmem:[%s2128_s21 + $0x9b0] sm:$0xff] %v991_v56  ;;  %1504 = vst [vmem:[%s2128_s21 + $0x9b8] sm:$0xff] %v992_v57  ;;  %v1021_v53 = vmul.f32 %v2107_v6, %v508_v50  ;;  %v1022_v54 = vmul.f32 %v2107_v6, %v509_v51  ;;  %v510_v55 = vld [vmem:[%s2095_s6 + $0xab0] sm:$0xff]  ;;  %v511_v56 = vld [vmem:[%s2095_s6 + $0xab8] sm:$0xff] }
  0xe1   : > { %1505 = vst [vmem:[%s2128_s21 + $0x9c0] sm:$0xff] %v993_v61  ;;  %1506 = vst [vmem:[%s2128_s21 + $0x9c8] sm:$0xff] %v994_v62  ;;  %v512_v57 = vld [vmem:[%s2095_s6 + $0xac0] sm:$0xff]  ;;  %v1023_v58 = vmul.f32 %v2107_v6, %v510_v55  ;;  %v1024_v59 = vmul.f32 %v2107_v6, %v511_v56  ;;  %v513_v61 = vld [vmem:[%s2095_s6 + $0xac8] sm:$0xff] }
  0xe2   : > { %1507 = vst [vmem:[%s2128_s21 + $0x9d0] sm:$0xff] %v995_v63  ;;  %1508 = vst [vmem:[%s2128_s21 + $0x9d8] sm:$0xff] %v996_v3  ;;  %v1025_v60 = vmul.f32 %v2107_v6, %v512_v57  ;;  %v514_v62 = vld [vmem:[%s2095_s6 + $0xad0] sm:$0xff]  ;;  %v515_v63 = vld [vmem:[%s2095_s6 + $0xad8] sm:$0xff]  ;;  %v1026_v0 = vmul.f32 %v2107_v6, %v513_v61 }
  0xe3   : > { %1509 = vst [vmem:[%s2128_s21 + $0x9e0] sm:$0xff] %v997_v4  ;;  %1510 = vst [vmem:[%s2128_s21 + $0x9e8] sm:$0xff] %v998_v5  ;;  %v1027_v1 = vmul.f32 %v2107_v6, %v514_v62  ;;  %v1028_v2 = vmul.f32 %v2107_v6, %v515_v63  ;;  %v516_v3 = vld [vmem:[%s2095_s6 + $0xae0] sm:$0xff]  ;;  %v517_v4 = vld [vmem:[%s2095_s6 + $0xae8] sm:$0xff] }
  0xe4   : > { %1511 = vst [vmem:[%s2128_s21 + $0x9f0] sm:$0xff] %v999_v10  ;;  %1512 = vst [vmem:[%s2128_s21 + $0x9f8] sm:$0xff] %v1000_v11  ;;  %v518_v5 = vld [vmem:[%s2095_s6 + $0xaf0] sm:$0xff]  ;;  %v1029_v7 = vmul.f32 %v2107_v6, %v516_v3  ;;  %v1030_v8 = vmul.f32 %v2107_v6, %v517_v4  ;;  %v519_v10 = vld [vmem:[%s2095_s6 + $0xaf8] sm:$0xff] }
  0xe5   : > { %1513 = vst [vmem:[%s2128_s21 + $0xa00] sm:$0xff] %v1001_v12  ;;  %1514 = vst [vmem:[%s2128_s21 + $0xa08] sm:$0xff] %v1002_v16  ;;  %v1031_v9 = vmul.f32 %v2107_v6, %v518_v5  ;;  %v520_v11 = vld [vmem:[%s2095_s6 + $0xb00] sm:$0xff]  ;;  %v521_v12 = vld [vmem:[%s2095_s6 + $0xb08] sm:$0xff]  ;;  %v1032_v13 = vmul.f32 %v2107_v6, %v519_v10 }
  0xe6   : > { %1515 = vst [vmem:[%s2128_s21 + $0xa10] sm:$0xff] %v1003_v17  ;;  %1516 = vst [vmem:[%s2128_s21 + $0xa18] sm:$0xff] %v1004_v18  ;;  %v1033_v14 = vmul.f32 %v2107_v6, %v520_v11  ;;  %v1034_v15 = vmul.f32 %v2107_v6, %v521_v12  ;;  %v522_v16 = vld [vmem:[%s2095_s6 + $0xb10] sm:$0xff]  ;;  %v523_v17 = vld [vmem:[%s2095_s6 + $0xb18] sm:$0xff] }
  0xe7   : > { %1517 = vst [vmem:[%s2128_s21 + $0xa20] sm:$0xff] %v1005_v22  ;;  %1518 = vst [vmem:[%s2128_s21 + $0xa28] sm:$0xff] %v1006_v23  ;;  %v524_v18 = vld [vmem:[%s2095_s6 + $0xb20] sm:$0xff]  ;;  %v1035_v19 = vmul.f32 %v2107_v6, %v522_v16  ;;  %v1036_v20 = vmul.f32 %v2107_v6, %v523_v17  ;;  %v525_v22 = vld [vmem:[%s2095_s6 + $0xb28] sm:$0xff] }
  0xe8   : > { %1519 = vst [vmem:[%s2128_s21 + $0xa30] sm:$0xff] %v1007_v24  ;;  %1520 = vst [vmem:[%s2128_s21 + $0xa38] sm:$0xff] %v1008_v28  ;;  %v1037_v21 = vmul.f32 %v2107_v6, %v524_v18  ;;  %v526_v23 = vld [vmem:[%s2095_s6 + $0xb30] sm:$0xff]  ;;  %v527_v24 = vld [vmem:[%s2095_s6 + $0xb38] sm:$0xff]  ;;  %v1038_v25 = vmul.f32 %v2107_v6, %v525_v22 }
  0xe9   : > { %1521 = vst [vmem:[%s2128_s21 + $0xa40] sm:$0xff] %v1009_v29  ;;  %1522 = vst [vmem:[%s2128_s21 + $0xa48] sm:$0xff] %v1010_v30  ;;  %v1039_v26 = vmul.f32 %v2107_v6, %v526_v23  ;;  %v1040_v27 = vmul.f32 %v2107_v6, %v527_v24  ;;  %v528_v28 = vld [vmem:[%s2095_s6 + $0xb40] sm:$0xff]  ;;  %v529_v29 = vld [vmem:[%s2095_s6 + $0xb48] sm:$0xff] }
  0xea   : > { %1523 = vst [vmem:[%s2128_s21 + $0xa50] sm:$0xff] %v1011_v34  ;;  %1524 = vst [vmem:[%s2128_s21 + $0xa58] sm:$0xff] %v1012_v35  ;;  %v530_v30 = vld [vmem:[%s2095_s6 + $0xb50] sm:$0xff]  ;;  %v1041_v31 = vmul.f32 %v2107_v6, %v528_v28  ;;  %v1042_v32 = vmul.f32 %v2107_v6, %v529_v29  ;;  %v531_v34 = vld [vmem:[%s2095_s6 + $0xb58] sm:$0xff] }
  0xeb   : > { %1525 = vst [vmem:[%s2128_s21 + $0xa60] sm:$0xff] %v1013_v36  ;;  %1526 = vst [vmem:[%s2128_s21 + $0xa68] sm:$0xff] %v1014_v40  ;;  %v1043_v33 = vmul.f32 %v2107_v6, %v530_v30  ;;  %v532_v35 = vld [vmem:[%s2095_s6 + $0xb60] sm:$0xff]  ;;  %v533_v36 = vld [vmem:[%s2095_s6 + $0xb68] sm:$0xff]  ;;  %v1044_v37 = vmul.f32 %v2107_v6, %v531_v34 }
  0xec   : > { %1527 = vst [vmem:[%s2128_s21 + $0xa70] sm:$0xff] %v1015_v41  ;;  %1528 = vst [vmem:[%s2128_s21 + $0xa78] sm:$0xff] %v1016_v42  ;;  %v1045_v38 = vmul.f32 %v2107_v6, %v532_v35  ;;  %v1046_v39 = vmul.f32 %v2107_v6, %v533_v36  ;;  %v534_v40 = vld [vmem:[%s2095_s6 + $0xb70] sm:$0xff]  ;;  %v535_v41 = vld [vmem:[%s2095_s6 + $0xb78] sm:$0xff] }
  0xed   : > { %1529 = vst [vmem:[%s2128_s21 + $0xa80] sm:$0xff] %v1017_v46  ;;  %1530 = vst [vmem:[%s2128_s21 + $0xa88] sm:$0xff] %v1018_v47  ;;  %v536_v42 = vld [vmem:[%s2095_s6 + $0xb80] sm:$0xff]  ;;  %v1047_v43 = vmul.f32 %v2107_v6, %v534_v40  ;;  %v1048_v44 = vmul.f32 %v2107_v6, %v535_v41  ;;  %v537_v46 = vld [vmem:[%s2095_s6 + $0xb88] sm:$0xff] }
  0xee   : > { %1531 = vst [vmem:[%s2128_s21 + $0xa90] sm:$0xff] %v1019_v48  ;;  %1532 = vst [vmem:[%s2128_s21 + $0xa98] sm:$0xff] %v1020_v52  ;;  %v1049_v45 = vmul.f32 %v2107_v6, %v536_v42  ;;  %v538_v47 = vld [vmem:[%s2095_s6 + $0xb90] sm:$0xff]  ;;  %v539_v48 = vld [vmem:[%s2095_s6 + $0xb98] sm:$0xff]  ;;  %v1050_v49 = vmul.f32 %v2107_v6, %v537_v46 }
  0xef   : > { %1533 = vst [vmem:[%s2128_s21 + $0xaa0] sm:$0xff] %v1021_v53  ;;  %1534 = vst [vmem:[%s2128_s21 + $0xaa8] sm:$0xff] %v1022_v54  ;;  %v1051_v50 = vmul.f32 %v2107_v6, %v538_v47  ;;  %v1052_v51 = vmul.f32 %v2107_v6, %v539_v48  ;;  %v540_v52 = vld [vmem:[%s2095_s6 + $0xba0] sm:$0xff]  ;;  %v541_v53 = vld [vmem:[%s2095_s6 + $0xba8] sm:$0xff] }
  0xf0   : > { %1535 = vst [vmem:[%s2128_s21 + $0xab0] sm:$0xff] %v1023_v58  ;;  %1536 = vst [vmem:[%s2128_s21 + $0xab8] sm:$0xff] %v1024_v59  ;;  %v542_v54 = vld [vmem:[%s2095_s6 + $0xbb0] sm:$0xff]  ;;  %v1053_v55 = vmul.f32 %v2107_v6, %v540_v52  ;;  %v1054_v56 = vmul.f32 %v2107_v6, %v541_v53  ;;  %v543_v58 = vld [vmem:[%s2095_s6 + $0xbb8] sm:$0xff] }
  0xf1   : > { %1537 = vst [vmem:[%s2128_s21 + $0xac0] sm:$0xff] %v1025_v60  ;;  %1538 = vst [vmem:[%s2128_s21 + $0xac8] sm:$0xff] %v1026_v0  ;;  %v1055_v57 = vmul.f32 %v2107_v6, %v542_v54  ;;  %v544_v59 = vld [vmem:[%s2095_s6 + $0xbc0] sm:$0xff]  ;;  %v545_v60 = vld [vmem:[%s2095_s6 + $0xbc8] sm:$0xff]  ;;  %v1056_v61 = vmul.f32 %v2107_v6, %v543_v58 }
  0xf2   : > { %1539 = vst [vmem:[%s2128_s21 + $0xad0] sm:$0xff] %v1027_v1  ;;  %1540 = vst [vmem:[%s2128_s21 + $0xad8] sm:$0xff] %v1028_v2  ;;  %v1057_v62 = vmul.f32 %v2107_v6, %v544_v59  ;;  %v1058_v63 = vmul.f32 %v2107_v6, %v545_v60  ;;  %v546_v0 = vld [vmem:[%s2095_s6 + $0xbd0] sm:$0xff]  ;;  %v547_v1 = vld [vmem:[%s2095_s6 + $0xbd8] sm:$0xff] }
  0xf3   : > { %1541 = vst [vmem:[%s2128_s21 + $0xae0] sm:$0xff] %v1029_v7  ;;  %1542 = vst [vmem:[%s2128_s21 + $0xae8] sm:$0xff] %v1030_v8  ;;  %v548_v2 = vld [vmem:[%s2095_s6 + $0xbe0] sm:$0xff]  ;;  %v1059_v3 = vmul.f32 %v2107_v6, %v546_v0  ;;  %v1060_v4 = vmul.f32 %v2107_v6, %v547_v1  ;;  %v549_v7 = vld [vmem:[%s2095_s6 + $0xbe8] sm:$0xff] }
  0xf4   : > { %1543 = vst [vmem:[%s2128_s21 + $0xaf0] sm:$0xff] %v1031_v9  ;;  %1544 = vst [vmem:[%s2128_s21 + $0xaf8] sm:$0xff] %v1032_v13  ;;  %v1061_v5 = vmul.f32 %v2107_v6, %v548_v2  ;;  %v550_v8 = vld [vmem:[%s2095_s6 + $0xbf0] sm:$0xff]  ;;  %v551_v9 = vld [vmem:[%s2095_s6 + $0xbf8] sm:$0xff]  ;;  %v1062_v10 = vmul.f32 %v2107_v6, %v549_v7 }
  0xf5   : > { %1545 = vst [vmem:[%s2128_s21 + $0xb00] sm:$0xff] %v1033_v14  ;;  %1546 = vst [vmem:[%s2128_s21 + $0xb08] sm:$0xff] %v1034_v15  ;;  %v1063_v11 = vmul.f32 %v2107_v6, %v550_v8  ;;  %v1064_v12 = vmul.f32 %v2107_v6, %v551_v9  ;;  %v552_v13 = vld [vmem:[%s2095_s6 + $0xc00] sm:$0xff]  ;;  %v553_v14 = vld [vmem:[%s2095_s6 + $0xc08] sm:$0xff] }
  0xf6   : > { %1547 = vst [vmem:[%s2128_s21 + $0xb10] sm:$0xff] %v1035_v19  ;;  %1548 = vst [vmem:[%s2128_s21 + $0xb18] sm:$0xff] %v1036_v20  ;;  %v554_v15 = vld [vmem:[%s2095_s6 + $0xc10] sm:$0xff]  ;;  %v1065_v16 = vmul.f32 %v2107_v6, %v552_v13  ;;  %v1066_v17 = vmul.f32 %v2107_v6, %v553_v14  ;;  %v555_v19 = vld [vmem:[%s2095_s6 + $0xc18] sm:$0xff] }
  0xf7   : > { %1549 = vst [vmem:[%s2128_s21 + $0xb20] sm:$0xff] %v1037_v21  ;;  %1550 = vst [vmem:[%s2128_s21 + $0xb28] sm:$0xff] %v1038_v25  ;;  %v1067_v18 = vmul.f32 %v2107_v6, %v554_v15  ;;  %v556_v20 = vld [vmem:[%s2095_s6 + $0xc20] sm:$0xff]  ;;  %v557_v21 = vld [vmem:[%s2095_s6 + $0xc28] sm:$0xff]  ;;  %v1068_v22 = vmul.f32 %v2107_v6, %v555_v19 }
  0xf8   : > { %1551 = vst [vmem:[%s2128_s21 + $0xb30] sm:$0xff] %v1039_v26  ;;  %1552 = vst [vmem:[%s2128_s21 + $0xb38] sm:$0xff] %v1040_v27  ;;  %v1069_v23 = vmul.f32 %v2107_v6, %v556_v20  ;;  %v1070_v24 = vmul.f32 %v2107_v6, %v557_v21  ;;  %v558_v25 = vld [vmem:[%s2095_s6 + $0xc30] sm:$0xff]  ;;  %v559_v26 = vld [vmem:[%s2095_s6 + $0xc38] sm:$0xff] }
  0xf9   : > { %1553 = vst [vmem:[%s2128_s21 + $0xb40] sm:$0xff] %v1041_v31  ;;  %1554 = vst [vmem:[%s2128_s21 + $0xb48] sm:$0xff] %v1042_v32  ;;  %v560_v27 = vld [vmem:[%s2095_s6 + $0xc40] sm:$0xff]  ;;  %v1071_v28 = vmul.f32 %v2107_v6, %v558_v25  ;;  %v1072_v29 = vmul.f32 %v2107_v6, %v559_v26  ;;  %v561_v31 = vld [vmem:[%s2095_s6 + $0xc48] sm:$0xff] }
  0xfa   : > { %1555 = vst [vmem:[%s2128_s21 + $0xb50] sm:$0xff] %v1043_v33  ;;  %1556 = vst [vmem:[%s2128_s21 + $0xb58] sm:$0xff] %v1044_v37  ;;  %v1073_v30 = vmul.f32 %v2107_v6, %v560_v27  ;;  %v562_v32 = vld [vmem:[%s2095_s6 + $0xc50] sm:$0xff]  ;;  %v563_v33 = vld [vmem:[%s2095_s6 + $0xc58] sm:$0xff]  ;;  %v1074_v34 = vmul.f32 %v2107_v6, %v561_v31 }
  0xfb   : > { %1557 = vst [vmem:[%s2128_s21 + $0xb60] sm:$0xff] %v1045_v38  ;;  %1558 = vst [vmem:[%s2128_s21 + $0xb68] sm:$0xff] %v1046_v39  ;;  %v1075_v35 = vmul.f32 %v2107_v6, %v562_v32  ;;  %v1076_v36 = vmul.f32 %v2107_v6, %v563_v33  ;;  %v564_v37 = vld [vmem:[%s2095_s6 + $0xc60] sm:$0xff]  ;;  %v565_v38 = vld [vmem:[%s2095_s6 + $0xc68] sm:$0xff] }
  0xfc   : > { %1559 = vst [vmem:[%s2128_s21 + $0xb70] sm:$0xff] %v1047_v43  ;;  %1560 = vst [vmem:[%s2128_s21 + $0xb78] sm:$0xff] %v1048_v44  ;;  %v566_v39 = vld [vmem:[%s2095_s6 + $0xc70] sm:$0xff]  ;;  %v1077_v40 = vmul.f32 %v2107_v6, %v564_v37  ;;  %v1078_v41 = vmul.f32 %v2107_v6, %v565_v38  ;;  %v567_v43 = vld [vmem:[%s2095_s6 + $0xc78] sm:$0xff] }
  0xfd   : > { %1561 = vst [vmem:[%s2128_s21 + $0xb80] sm:$0xff] %v1049_v45  ;;  %1562 = vst [vmem:[%s2128_s21 + $0xb88] sm:$0xff] %v1050_v49  ;;  %v1079_v42 = vmul.f32 %v2107_v6, %v566_v39  ;;  %v568_v44 = vld [vmem:[%s2095_s6 + $0xc80] sm:$0xff]  ;;  %v569_v45 = vld [vmem:[%s2095_s6 + $0xc88] sm:$0xff]  ;;  %v1080_v46 = vmul.f32 %v2107_v6, %v567_v43 }
  0xfe   : > { %1563 = vst [vmem:[%s2128_s21 + $0xb90] sm:$0xff] %v1051_v50  ;;  %1564 = vst [vmem:[%s2128_s21 + $0xb98] sm:$0xff] %v1052_v51  ;;  %v1081_v47 = vmul.f32 %v2107_v6, %v568_v44  ;;  %v1082_v48 = vmul.f32 %v2107_v6, %v569_v45  ;;  %v570_v49 = vld [vmem:[%s2095_s6 + $0xc90] sm:$0xff]  ;;  %v571_v50 = vld [vmem:[%s2095_s6 + $0xc98] sm:$0xff] }
  0xff   : > { %1565 = vst [vmem:[%s2128_s21 + $0xba0] sm:$0xff] %v1053_v55  ;;  %1566 = vst [vmem:[%s2128_s21 + $0xba8] sm:$0xff] %v1054_v56  ;;  %v572_v51 = vld [vmem:[%s2095_s6 + $0xca0] sm:$0xff]  ;;  %v1083_v52 = vmul.f32 %v2107_v6, %v570_v49  ;;  %v1084_v53 = vmul.f32 %v2107_v6, %v571_v50  ;;  %v573_v55 = vld [vmem:[%s2095_s6 + $0xca8] sm:$0xff] }
 0x100   : > { %1567 = vst [vmem:[%s2128_s21 + $0xbb0] sm:$0xff] %v1055_v57  ;;  %1568 = vst [vmem:[%s2128_s21 + $0xbb8] sm:$0xff] %v1056_v61  ;;  %v1085_v54 = vmul.f32 %v2107_v6, %v572_v51  ;;  %v574_v56 = vld [vmem:[%s2095_s6 + $0xcb0] sm:$0xff]  ;;  %v575_v57 = vld [vmem:[%s2095_s6 + $0xcb8] sm:$0xff]  ;;  %v1086_v58 = vmul.f32 %v2107_v6, %v573_v55 }
 0x101   : > { %1569 = vst [vmem:[%s2128_s21 + $0xbc0] sm:$0xff] %v1057_v62  ;;  %1570 = vst [vmem:[%s2128_s21 + $0xbc8] sm:$0xff] %v1058_v63  ;;  %v1087_v59 = vmul.f32 %v2107_v6, %v574_v56  ;;  %v1088_v60 = vmul.f32 %v2107_v6, %v575_v57  ;;  %v576_v61 = vld [vmem:[%s2095_s6 + $0xcc0] sm:$0xff]  ;;  %v577_v62 = vld [vmem:[%s2095_s6 + $0xcc8] sm:$0xff] }
 0x102   : > { %1571 = vst [vmem:[%s2128_s21 + $0xbd0] sm:$0xff] %v1059_v3  ;;  %1572 = vst [vmem:[%s2128_s21 + $0xbd8] sm:$0xff] %v1060_v4  ;;  %v578_v63 = vld [vmem:[%s2095_s6 + $0xcd0] sm:$0xff]  ;;  %v1089_v0 = vmul.f32 %v2107_v6, %v576_v61  ;;  %v1090_v1 = vmul.f32 %v2107_v6, %v577_v62  ;;  %v579_v3 = vld [vmem:[%s2095_s6 + $0xcd8] sm:$0xff] }
 0x103   : > { %1573 = vst [vmem:[%s2128_s21 + $0xbe0] sm:$0xff] %v1061_v5  ;;  %1574 = vst [vmem:[%s2128_s21 + $0xbe8] sm:$0xff] %v1062_v10  ;;  %v1091_v2 = vmul.f32 %v2107_v6, %v578_v63  ;;  %v580_v4 = vld [vmem:[%s2095_s6 + $0xce0] sm:$0xff]  ;;  %v581_v5 = vld [vmem:[%s2095_s6 + $0xce8] sm:$0xff]  ;;  %v1092_v7 = vmul.f32 %v2107_v6, %v579_v3 }
 0x104   : > { %1575 = vst [vmem:[%s2128_s21 + $0xbf0] sm:$0xff] %v1063_v11  ;;  %1576 = vst [vmem:[%s2128_s21 + $0xbf8] sm:$0xff] %v1064_v12  ;;  %v1093_v8 = vmul.f32 %v2107_v6, %v580_v4  ;;  %v1094_v9 = vmul.f32 %v2107_v6, %v581_v5  ;;  %v582_v10 = vld [vmem:[%s2095_s6 + $0xcf0] sm:$0xff]  ;;  %v583_v11 = vld [vmem:[%s2095_s6 + $0xcf8] sm:$0xff] }
 0x105   : > { %1577 = vst [vmem:[%s2128_s21 + $0xc00] sm:$0xff] %v1065_v16  ;;  %1578 = vst [vmem:[%s2128_s21 + $0xc08] sm:$0xff] %v1066_v17  ;;  %v584_v12 = vld [vmem:[%s2095_s6 + $0xd00] sm:$0xff]  ;;  %v1095_v13 = vmul.f32 %v2107_v6, %v582_v10  ;;  %v1096_v14 = vmul.f32 %v2107_v6, %v583_v11  ;;  %v585_v16 = vld [vmem:[%s2095_s6 + $0xd08] sm:$0xff] }
 0x106   : > { %1579 = vst [vmem:[%s2128_s21 + $0xc10] sm:$0xff] %v1067_v18  ;;  %1580 = vst [vmem:[%s2128_s21 + $0xc18] sm:$0xff] %v1068_v22  ;;  %v1097_v15 = vmul.f32 %v2107_v6, %v584_v12  ;;  %v586_v17 = vld [vmem:[%s2095_s6 + $0xd10] sm:$0xff]  ;;  %v587_v18 = vld [vmem:[%s2095_s6 + $0xd18] sm:$0xff]  ;;  %v1098_v19 = vmul.f32 %v2107_v6, %v585_v16 }
 0x107   : > { %1581 = vst [vmem:[%s2128_s21 + $0xc20] sm:$0xff] %v1069_v23  ;;  %1582 = vst [vmem:[%s2128_s21 + $0xc28] sm:$0xff] %v1070_v24  ;;  %v1099_v20 = vmul.f32 %v2107_v6, %v586_v17  ;;  %v1100_v21 = vmul.f32 %v2107_v6, %v587_v18  ;;  %v588_v22 = vld [vmem:[%s2095_s6 + $0xd20] sm:$0xff]  ;;  %v589_v23 = vld [vmem:[%s2095_s6 + $0xd28] sm:$0xff] }
 0x108   : > { %1583 = vst [vmem:[%s2128_s21 + $0xc30] sm:$0xff] %v1071_v28  ;;  %1584 = vst [vmem:[%s2128_s21 + $0xc38] sm:$0xff] %v1072_v29  ;;  %v590_v24 = vld [vmem:[%s2095_s6 + $0xd30] sm:$0xff]  ;;  %v1101_v25 = vmul.f32 %v2107_v6, %v588_v22  ;;  %v1102_v26 = vmul.f32 %v2107_v6, %v589_v23  ;;  %v591_v28 = vld [vmem:[%s2095_s6 + $0xd38] sm:$0xff] }
 0x109   : > { %1585 = vst [vmem:[%s2128_s21 + $0xc40] sm:$0xff] %v1073_v30  ;;  %1586 = vst [vmem:[%s2128_s21 + $0xc48] sm:$0xff] %v1074_v34  ;;  %v1103_v27 = vmul.f32 %v2107_v6, %v590_v24  ;;  %v592_v29 = vld [vmem:[%s2095_s6 + $0xd40] sm:$0xff]  ;;  %v593_v30 = vld [vmem:[%s2095_s6 + $0xd48] sm:$0xff]  ;;  %v1104_v31 = vmul.f32 %v2107_v6, %v591_v28 }
 0x10a   : > { %1587 = vst [vmem:[%s2128_s21 + $0xc50] sm:$0xff] %v1075_v35  ;;  %1588 = vst [vmem:[%s2128_s21 + $0xc58] sm:$0xff] %v1076_v36  ;;  %v1105_v32 = vmul.f32 %v2107_v6, %v592_v29  ;;  %v1106_v33 = vmul.f32 %v2107_v6, %v593_v30  ;;  %v594_v34 = vld [vmem:[%s2095_s6 + $0xd50] sm:$0xff]  ;;  %v595_v35 = vld [vmem:[%s2095_s6 + $0xd58] sm:$0xff] }
 0x10b   : > { %1589 = vst [vmem:[%s2128_s21 + $0xc60] sm:$0xff] %v1077_v40  ;;  %1590 = vst [vmem:[%s2128_s21 + $0xc68] sm:$0xff] %v1078_v41  ;;  %v596_v36 = vld [vmem:[%s2095_s6 + $0xd60] sm:$0xff]  ;;  %v1107_v37 = vmul.f32 %v2107_v6, %v594_v34  ;;  %v1108_v38 = vmul.f32 %v2107_v6, %v595_v35  ;;  %v597_v40 = vld [vmem:[%s2095_s6 + $0xd68] sm:$0xff] }
 0x10c   : > { %1591 = vst [vmem:[%s2128_s21 + $0xc70] sm:$0xff] %v1079_v42  ;;  %1592 = vst [vmem:[%s2128_s21 + $0xc78] sm:$0xff] %v1080_v46  ;;  %v1109_v39 = vmul.f32 %v2107_v6, %v596_v36  ;;  %v598_v41 = vld [vmem:[%s2095_s6 + $0xd70] sm:$0xff]  ;;  %v599_v42 = vld [vmem:[%s2095_s6 + $0xd78] sm:$0xff]  ;;  %v1110_v43 = vmul.f32 %v2107_v6, %v597_v40 }
 0x10d   : > { %1593 = vst [vmem:[%s2128_s21 + $0xc80] sm:$0xff] %v1081_v47  ;;  %1594 = vst [vmem:[%s2128_s21 + $0xc88] sm:$0xff] %v1082_v48  ;;  %v1111_v44 = vmul.f32 %v2107_v6, %v598_v41  ;;  %v1112_v45 = vmul.f32 %v2107_v6, %v599_v42  ;;  %v600_v46 = vld [vmem:[%s2095_s6 + $0xd80] sm:$0xff]  ;;  %v601_v47 = vld [vmem:[%s2095_s6 + $0xd88] sm:$0xff] }
 0x10e   : > { %1595 = vst [vmem:[%s2128_s21 + $0xc90] sm:$0xff] %v1083_v52  ;;  %1596 = vst [vmem:[%s2128_s21 + $0xc98] sm:$0xff] %v1084_v53  ;;  %v602_v48 = vld [vmem:[%s2095_s6 + $0xd90] sm:$0xff]  ;;  %v1113_v49 = vmul.f32 %v2107_v6, %v600_v46  ;;  %v1114_v50 = vmul.f32 %v2107_v6, %v601_v47  ;;  %v603_v52 = vld [vmem:[%s2095_s6 + $0xd98] sm:$0xff] }
 0x10f   : > { %1597 = vst [vmem:[%s2128_s21 + $0xca0] sm:$0xff] %v1085_v54  ;;  %1598 = vst [vmem:[%s2128_s21 + $0xca8] sm:$0xff] %v1086_v58  ;;  %v1115_v51 = vmul.f32 %v2107_v6, %v602_v48  ;;  %v604_v53 = vld [vmem:[%s2095_s6 + $0xda0] sm:$0xff]  ;;  %v605_v54 = vld [vmem:[%s2095_s6 + $0xda8] sm:$0xff]  ;;  %v1116_v55 = vmul.f32 %v2107_v6, %v603_v52 }
 0x110   : > { %1599 = vst [vmem:[%s2128_s21 + $0xcb0] sm:$0xff] %v1087_v59  ;;  %1600 = vst [vmem:[%s2128_s21 + $0xcb8] sm:$0xff] %v1088_v60  ;;  %v1117_v56 = vmul.f32 %v2107_v6, %v604_v53  ;;  %v1118_v57 = vmul.f32 %v2107_v6, %v605_v54  ;;  %v606_v58 = vld [vmem:[%s2095_s6 + $0xdb0] sm:$0xff]  ;;  %v607_v59 = vld [vmem:[%s2095_s6 + $0xdb8] sm:$0xff] }
 0x111   : > { %1601 = vst [vmem:[%s2128_s21 + $0xcc0] sm:$0xff] %v1089_v0  ;;  %1602 = vst [vmem:[%s2128_s21 + $0xcc8] sm:$0xff] %v1090_v1  ;;  %v608_v60 = vld [vmem:[%s2095_s6 + $0xdc0] sm:$0xff]  ;;  %v1119_v61 = vmul.f32 %v2107_v6, %v606_v58  ;;  %v1120_v62 = vmul.f32 %v2107_v6, %v607_v59  ;;  %v609_v0 = vld [vmem:[%s2095_s6 + $0xdc8] sm:$0xff] }
 0x112   : > { %1603 = vst [vmem:[%s2128_s21 + $0xcd0] sm:$0xff] %v1091_v2  ;;  %1604 = vst [vmem:[%s2128_s21 + $0xcd8] sm:$0xff] %v1092_v7  ;;  %v1121_v63 = vmul.f32 %v2107_v6, %v608_v60  ;;  %v610_v1 = vld [vmem:[%s2095_s6 + $0xdd0] sm:$0xff]  ;;  %v611_v2 = vld [vmem:[%s2095_s6 + $0xdd8] sm:$0xff]  ;;  %v1122_v3 = vmul.f32 %v2107_v6, %v609_v0 }
 0x113   : > { %1605 = vst [vmem:[%s2128_s21 + $0xce0] sm:$0xff] %v1093_v8  ;;  %1606 = vst [vmem:[%s2128_s21 + $0xce8] sm:$0xff] %v1094_v9  ;;  %v1123_v4 = vmul.f32 %v2107_v6, %v610_v1  ;;  %v1124_v5 = vmul.f32 %v2107_v6, %v611_v2  ;;  %v612_v7 = vld [vmem:[%s2095_s6 + $0xde0] sm:$0xff]  ;;  %v613_v8 = vld [vmem:[%s2095_s6 + $0xde8] sm:$0xff] }
 0x114   : > { %1607 = vst [vmem:[%s2128_s21 + $0xcf0] sm:$0xff] %v1095_v13  ;;  %1608 = vst [vmem:[%s2128_s21 + $0xcf8] sm:$0xff] %v1096_v14  ;;  %v614_v9 = vld [vmem:[%s2095_s6 + $0xdf0] sm:$0xff]  ;;  %v1125_v10 = vmul.f32 %v2107_v6, %v612_v7  ;;  %v1126_v11 = vmul.f32 %v2107_v6, %v613_v8  ;;  %v615_v13 = vld [vmem:[%s2095_s6 + $0xdf8] sm:$0xff] }
 0x115   : > { %1609 = vst [vmem:[%s2128_s21 + $0xd00] sm:$0xff] %v1097_v15  ;;  %1610 = vst [vmem:[%s2128_s21 + $0xd08] sm:$0xff] %v1098_v19  ;;  %v1127_v12 = vmul.f32 %v2107_v6, %v614_v9  ;;  %v616_v14 = vld [vmem:[%s2095_s6 + $0xe00] sm:$0xff]  ;;  %v617_v15 = vld [vmem:[%s2095_s6 + $0xe08] sm:$0xff]  ;;  %v1128_v16 = vmul.f32 %v2107_v6, %v615_v13 }
 0x116   : > { %1611 = vst [vmem:[%s2128_s21 + $0xd10] sm:$0xff] %v1099_v20  ;;  %1612 = vst [vmem:[%s2128_s21 + $0xd18] sm:$0xff] %v1100_v21  ;;  %v1129_v17 = vmul.f32 %v2107_v6, %v616_v14  ;;  %v1130_v18 = vmul.f32 %v2107_v6, %v617_v15  ;;  %v618_v19 = vld [vmem:[%s2095_s6 + $0xe10] sm:$0xff]  ;;  %v619_v20 = vld [vmem:[%s2095_s6 + $0xe18] sm:$0xff] }
 0x117   : > { %1613 = vst [vmem:[%s2128_s21 + $0xd20] sm:$0xff] %v1101_v25  ;;  %1614 = vst [vmem:[%s2128_s21 + $0xd28] sm:$0xff] %v1102_v26  ;;  %v620_v21 = vld [vmem:[%s2095_s6 + $0xe20] sm:$0xff]  ;;  %v1131_v22 = vmul.f32 %v2107_v6, %v618_v19  ;;  %v1132_v23 = vmul.f32 %v2107_v6, %v619_v20  ;;  %v621_v25 = vld [vmem:[%s2095_s6 + $0xe28] sm:$0xff] }
 0x118   : > { %1615 = vst [vmem:[%s2128_s21 + $0xd30] sm:$0xff] %v1103_v27  ;;  %1616 = vst [vmem:[%s2128_s21 + $0xd38] sm:$0xff] %v1104_v31  ;;  %v1133_v24 = vmul.f32 %v2107_v6, %v620_v21  ;;  %v622_v26 = vld [vmem:[%s2095_s6 + $0xe30] sm:$0xff]  ;;  %v623_v27 = vld [vmem:[%s2095_s6 + $0xe38] sm:$0xff]  ;;  %v1134_v28 = vmul.f32 %v2107_v6, %v621_v25 }
 0x119   : > { %1617 = vst [vmem:[%s2128_s21 + $0xd40] sm:$0xff] %v1105_v32  ;;  %1618 = vst [vmem:[%s2128_s21 + $0xd48] sm:$0xff] %v1106_v33  ;;  %v1135_v29 = vmul.f32 %v2107_v6, %v622_v26  ;;  %v1136_v30 = vmul.f32 %v2107_v6, %v623_v27  ;;  %v624_v31 = vld [vmem:[%s2095_s6 + $0xe40] sm:$0xff]  ;;  %v625_v32 = vld [vmem:[%s2095_s6 + $0xe48] sm:$0xff] }
 0x11a   : > { %1619 = vst [vmem:[%s2128_s21 + $0xd50] sm:$0xff] %v1107_v37  ;;  %1620 = vst [vmem:[%s2128_s21 + $0xd58] sm:$0xff] %v1108_v38  ;;  %v626_v33 = vld [vmem:[%s2095_s6 + $0xe50] sm:$0xff]  ;;  %v1137_v34 = vmul.f32 %v2107_v6, %v624_v31  ;;  %v1138_v35 = vmul.f32 %v2107_v6, %v625_v32  ;;  %v627_v37 = vld [vmem:[%s2095_s6 + $0xe58] sm:$0xff] }
 0x11b   : > { %1621 = vst [vmem:[%s2128_s21 + $0xd60] sm:$0xff] %v1109_v39  ;;  %1622 = vst [vmem:[%s2128_s21 + $0xd68] sm:$0xff] %v1110_v43  ;;  %v1139_v36 = vmul.f32 %v2107_v6, %v626_v33  ;;  %v628_v38 = vld [vmem:[%s2095_s6 + $0xe60] sm:$0xff]  ;;  %v629_v39 = vld [vmem:[%s2095_s6 + $0xe68] sm:$0xff]  ;;  %v1140_v40 = vmul.f32 %v2107_v6, %v627_v37 }
 0x11c   : > { %1623 = vst [vmem:[%s2128_s21 + $0xd70] sm:$0xff] %v1111_v44  ;;  %1624 = vst [vmem:[%s2128_s21 + $0xd78] sm:$0xff] %v1112_v45  ;;  %v1141_v41 = vmul.f32 %v2107_v6, %v628_v38  ;;  %v1142_v42 = vmul.f32 %v2107_v6, %v629_v39  ;;  %v630_v43 = vld [vmem:[%s2095_s6 + $0xe70] sm:$0xff]  ;;  %v631_v44 = vld [vmem:[%s2095_s6 + $0xe78] sm:$0xff] }
 0x11d   : > { %1625 = vst [vmem:[%s2128_s21 + $0xd80] sm:$0xff] %v1113_v49  ;;  %1626 = vst [vmem:[%s2128_s21 + $0xd88] sm:$0xff] %v1114_v50  ;;  %v632_v45 = vld [vmem:[%s2095_s6 + $0xe80] sm:$0xff]  ;;  %v1143_v46 = vmul.f32 %v2107_v6, %v630_v43  ;;  %v1144_v47 = vmul.f32 %v2107_v6, %v631_v44  ;;  %v633_v49 = vld [vmem:[%s2095_s6 + $0xe88] sm:$0xff] }
 0x11e   : > { %1627 = vst [vmem:[%s2128_s21 + $0xd90] sm:$0xff] %v1115_v51  ;;  %1628 = vst [vmem:[%s2128_s21 + $0xd98] sm:$0xff] %v1116_v55  ;;  %v1145_v48 = vmul.f32 %v2107_v6, %v632_v45  ;;  %v634_v50 = vld [vmem:[%s2095_s6 + $0xe90] sm:$0xff]  ;;  %v635_v51 = vld [vmem:[%s2095_s6 + $0xe98] sm:$0xff]  ;;  %v1146_v52 = vmul.f32 %v2107_v6, %v633_v49 }
 0x11f   : > { %1629 = vst [vmem:[%s2128_s21 + $0xda0] sm:$0xff] %v1117_v56  ;;  %1630 = vst [vmem:[%s2128_s21 + $0xda8] sm:$0xff] %v1118_v57  ;;  %v1147_v53 = vmul.f32 %v2107_v6, %v634_v50  ;;  %v1148_v54 = vmul.f32 %v2107_v6, %v635_v51  ;;  %v636_v55 = vld [vmem:[%s2095_s6 + $0xea0] sm:$0xff]  ;;  %v637_v56 = vld [vmem:[%s2095_s6 + $0xea8] sm:$0xff] }
 0x120   : > { %1631 = vst [vmem:[%s2128_s21 + $0xdb0] sm:$0xff] %v1119_v61  ;;  %1632 = vst [vmem:[%s2128_s21 + $0xdb8] sm:$0xff] %v1120_v62  ;;  %v638_v57 = vld [vmem:[%s2095_s6 + $0xeb0] sm:$0xff]  ;;  %v1149_v58 = vmul.f32 %v2107_v6, %v636_v55  ;;  %v1150_v59 = vmul.f32 %v2107_v6, %v637_v56  ;;  %v639_v61 = vld [vmem:[%s2095_s6 + $0xeb8] sm:$0xff] }
 0x121   : > { %1633 = vst [vmem:[%s2128_s21 + $0xdc0] sm:$0xff] %v1121_v63  ;;  %1634 = vst [vmem:[%s2128_s21 + $0xdc8] sm:$0xff] %v1122_v3  ;;  %v1151_v60 = vmul.f32 %v2107_v6, %v638_v57  ;;  %v640_v62 = vld [vmem:[%s2095_s6 + $0xec0] sm:$0xff]  ;;  %v641_v63 = vld [vmem:[%s2095_s6 + $0xec8] sm:$0xff]  ;;  %v1152_v0 = vmul.f32 %v2107_v6, %v639_v61 }
 0x122   : > { %1635 = vst [vmem:[%s2128_s21 + $0xdd0] sm:$0xff] %v1123_v4  ;;  %1636 = vst [vmem:[%s2128_s21 + $0xdd8] sm:$0xff] %v1124_v5  ;;  %v1153_v1 = vmul.f32 %v2107_v6, %v640_v62  ;;  %v1154_v2 = vmul.f32 %v2107_v6, %v641_v63  ;;  %v642_v3 = vld [vmem:[%s2095_s6 + $0xed0] sm:$0xff]  ;;  %v643_v4 = vld [vmem:[%s2095_s6 + $0xed8] sm:$0xff] }
 0x123   : > { %1637 = vst [vmem:[%s2128_s21 + $0xde0] sm:$0xff] %v1125_v10  ;;  %1638 = vst [vmem:[%s2128_s21 + $0xde8] sm:$0xff] %v1126_v11  ;;  %v644_v5 = vld [vmem:[%s2095_s6 + $0xee0] sm:$0xff]  ;;  %v1155_v7 = vmul.f32 %v2107_v6, %v642_v3  ;;  %v1156_v8 = vmul.f32 %v2107_v6, %v643_v4  ;;  %v645_v10 = vld [vmem:[%s2095_s6 + $0xee8] sm:$0xff] }
 0x124   : > { %1639 = vst [vmem:[%s2128_s21 + $0xdf0] sm:$0xff] %v1127_v12  ;;  %1640 = vst [vmem:[%s2128_s21 + $0xdf8] sm:$0xff] %v1128_v16  ;;  %v1157_v9 = vmul.f32 %v2107_v6, %v644_v5  ;;  %v646_v11 = vld [vmem:[%s2095_s6 + $0xef0] sm:$0xff]  ;;  %v647_v12 = vld [vmem:[%s2095_s6 + $0xef8] sm:$0xff]  ;;  %v1158_v13 = vmul.f32 %v2107_v6, %v645_v10 }
 0x125   : > { %1641 = vst [vmem:[%s2128_s21 + $0xe00] sm:$0xff] %v1129_v17  ;;  %1642 = vst [vmem:[%s2128_s21 + $0xe08] sm:$0xff] %v1130_v18  ;;  %v1159_v14 = vmul.f32 %v2107_v6, %v646_v11  ;;  %v1160_v15 = vmul.f32 %v2107_v6, %v647_v12  ;;  %v648_v16 = vld [vmem:[%s2095_s6 + $0xf00] sm:$0xff]  ;;  %v649_v17 = vld [vmem:[%s2095_s6 + $0xf08] sm:$0xff] }
 0x126   : > { %1643 = vst [vmem:[%s2128_s21 + $0xe10] sm:$0xff] %v1131_v22  ;;  %1644 = vst [vmem:[%s2128_s21 + $0xe18] sm:$0xff] %v1132_v23  ;;  %v650_v18 = vld [vmem:[%s2095_s6 + $0xf10] sm:$0xff]  ;;  %v1161_v19 = vmul.f32 %v2107_v6, %v648_v16  ;;  %v1162_v20 = vmul.f32 %v2107_v6, %v649_v17  ;;  %v651_v22 = vld [vmem:[%s2095_s6 + $0xf18] sm:$0xff] }
 0x127   : > { %1645 = vst [vmem:[%s2128_s21 + $0xe20] sm:$0xff] %v1133_v24  ;;  %1646 = vst [vmem:[%s2128_s21 + $0xe28] sm:$0xff] %v1134_v28  ;;  %v1163_v21 = vmul.f32 %v2107_v6, %v650_v18  ;;  %v652_v23 = vld [vmem:[%s2095_s6 + $0xf20] sm:$0xff]  ;;  %v653_v24 = vld [vmem:[%s2095_s6 + $0xf28] sm:$0xff]  ;;  %v1164_v25 = vmul.f32 %v2107_v6, %v651_v22 }
 0x128   : > { %1647 = vst [vmem:[%s2128_s21 + $0xe30] sm:$0xff] %v1135_v29  ;;  %1648 = vst [vmem:[%s2128_s21 + $0xe38] sm:$0xff] %v1136_v30  ;;  %v1165_v26 = vmul.f32 %v2107_v6, %v652_v23  ;;  %v1166_v27 = vmul.f32 %v2107_v6, %v653_v24  ;;  %v654_v28 = vld [vmem:[%s2095_s6 + $0xf30] sm:$0xff]  ;;  %v655_v29 = vld [vmem:[%s2095_s6 + $0xf38] sm:$0xff] }
 0x129   : > { %1649 = vst [vmem:[%s2128_s21 + $0xe40] sm:$0xff] %v1137_v34  ;;  %1650 = vst [vmem:[%s2128_s21 + $0xe48] sm:$0xff] %v1138_v35  ;;  %v656_v30 = vld [vmem:[%s2095_s6 + $0xf40] sm:$0xff]  ;;  %v1167_v31 = vmul.f32 %v2107_v6, %v654_v28  ;;  %v1168_v32 = vmul.f32 %v2107_v6, %v655_v29  ;;  %v657_v34 = vld [vmem:[%s2095_s6 + $0xf48] sm:$0xff] }
 0x12a   : > { %1651 = vst [vmem:[%s2128_s21 + $0xe50] sm:$0xff] %v1139_v36  ;;  %1652 = vst [vmem:[%s2128_s21 + $0xe58] sm:$0xff] %v1140_v40  ;;  %v1169_v33 = vmul.f32 %v2107_v6, %v656_v30  ;;  %v658_v35 = vld [vmem:[%s2095_s6 + $0xf50] sm:$0xff]  ;;  %v659_v36 = vld [vmem:[%s2095_s6 + $0xf58] sm:$0xff]  ;;  %v1170_v37 = vmul.f32 %v2107_v6, %v657_v34 }
 0x12b   : > { %1653 = vst [vmem:[%s2128_s21 + $0xe60] sm:$0xff] %v1141_v41  ;;  %1654 = vst [vmem:[%s2128_s21 + $0xe68] sm:$0xff] %v1142_v42  ;;  %v1171_v38 = vmul.f32 %v2107_v6, %v658_v35  ;;  %v1172_v39 = vmul.f32 %v2107_v6, %v659_v36  ;;  %v660_v40 = vld [vmem:[%s2095_s6 + $0xf60] sm:$0xff]  ;;  %v661_v41 = vld [vmem:[%s2095_s6 + $0xf68] sm:$0xff] }
 0x12c   : > { %1655 = vst [vmem:[%s2128_s21 + $0xe70] sm:$0xff] %v1143_v46  ;;  %1656 = vst [vmem:[%s2128_s21 + $0xe78] sm:$0xff] %v1144_v47  ;;  %v662_v42 = vld [vmem:[%s2095_s6 + $0xf70] sm:$0xff]  ;;  %v1173_v43 = vmul.f32 %v2107_v6, %v660_v40  ;;  %v1174_v44 = vmul.f32 %v2107_v6, %v661_v41  ;;  %v663_v46 = vld [vmem:[%s2095_s6 + $0xf78] sm:$0xff] }
 0x12d   : > { %1657 = vst [vmem:[%s2128_s21 + $0xe80] sm:$0xff] %v1145_v48  ;;  %1658 = vst [vmem:[%s2128_s21 + $0xe88] sm:$0xff] %v1146_v52  ;;  %v1175_v45 = vmul.f32 %v2107_v6, %v662_v42  ;;  %v664_v47 = vld [vmem:[%s2095_s6 + $0xf80] sm:$0xff]  ;;  %v665_v48 = vld [vmem:[%s2095_s6 + $0xf88] sm:$0xff]  ;;  %v1176_v49 = vmul.f32 %v2107_v6, %v663_v46 }
 0x12e   : > { %1659 = vst [vmem:[%s2128_s21 + $0xe90] sm:$0xff] %v1147_v53  ;;  %1660 = vst [vmem:[%s2128_s21 + $0xe98] sm:$0xff] %v1148_v54  ;;  %v1177_v50 = vmul.f32 %v2107_v6, %v664_v47  ;;  %v1178_v51 = vmul.f32 %v2107_v6, %v665_v48  ;;  %v666_v52 = vld [vmem:[%s2095_s6 + $0xf90] sm:$0xff]  ;;  %v667_v53 = vld [vmem:[%s2095_s6 + $0xf98] sm:$0xff] }
 0x12f   : > { %1661 = vst [vmem:[%s2128_s21 + $0xea0] sm:$0xff] %v1149_v58  ;;  %1662 = vst [vmem:[%s2128_s21 + $0xea8] sm:$0xff] %v1150_v59  ;;  %v668_v54 = vld [vmem:[%s2095_s6 + $0xfa0] sm:$0xff]  ;;  %v1179_v55 = vmul.f32 %v2107_v6, %v666_v52  ;;  %v1180_v56 = vmul.f32 %v2107_v6, %v667_v53  ;;  %v669_v58 = vld [vmem:[%s2095_s6 + $0xfa8] sm:$0xff] }
 0x130   : > { %1663 = vst [vmem:[%s2128_s21 + $0xeb0] sm:$0xff] %v1151_v60  ;;  %1664 = vst [vmem:[%s2128_s21 + $0xeb8] sm:$0xff] %v1152_v0  ;;  %v1181_v57 = vmul.f32 %v2107_v6, %v668_v54  ;;  %v670_v59 = vld [vmem:[%s2095_s6 + $0xfb0] sm:$0xff]  ;;  %v671_v60 = vld [vmem:[%s2095_s6 + $0xfb8] sm:$0xff]  ;;  %v1182_v61 = vmul.f32 %v2107_v6, %v669_v58 }
 0x131   : > { %1665 = vst [vmem:[%s2128_s21 + $0xec0] sm:$0xff] %v1153_v1  ;;  %1666 = vst [vmem:[%s2128_s21 + $0xec8] sm:$0xff] %v1154_v2  ;;  %v1183_v62 = vmul.f32 %v2107_v6, %v670_v59  ;;  %v1184_v63 = vmul.f32 %v2107_v6, %v671_v60  ;;  %v672_v0 = vld [vmem:[%s2095_s6 + $0xfc0] sm:$0xff]  ;;  %v673_v1 = vld [vmem:[%s2095_s6 + $0xfc8] sm:$0xff] }
 0x132   : > { %1667 = vst [vmem:[%s2128_s21 + $0xed0] sm:$0xff] %v1155_v7  ;;  %1668 = vst [vmem:[%s2128_s21 + $0xed8] sm:$0xff] %v1156_v8  ;;  %v674_v2 = vld [vmem:[%s2095_s6 + $0xfd0] sm:$0xff]  ;;  %v1185_v3 = vmul.f32 %v2107_v6, %v672_v0  ;;  %v1186_v4 = vmul.f32 %v2107_v6, %v673_v1  ;;  %v675_v7 = vld [vmem:[%s2095_s6 + $0xfd8] sm:$0xff] }
 0x133   : > { %1669 = vst [vmem:[%s2128_s21 + $0xee0] sm:$0xff] %v1157_v9  ;;  %1670 = vst [vmem:[%s2128_s21 + $0xee8] sm:$0xff] %v1158_v13  ;;  %v1187_v5 = vmul.f32 %v2107_v6, %v674_v2  ;;  %v676_v8 = vld [vmem:[%s2095_s6 + $0xfe0] sm:$0xff]  ;;  %v677_v9 = vld [vmem:[%s2095_s6 + $0xfe8] sm:$0xff]  ;;  %v1188_v10 = vmul.f32 %v2107_v6, %v675_v7 }
 0x134   : > { %1671 = vst [vmem:[%s2128_s21 + $0xef0] sm:$0xff] %v1159_v14  ;;  %1672 = vst [vmem:[%s2128_s21 + $0xef8] sm:$0xff] %v1160_v15  ;;  %v1189_v11 = vmul.f32 %v2107_v6, %v676_v8  ;;  %v1190_v12 = vmul.f32 %v2107_v6, %v677_v9  ;;  %v678_v13 = vld [vmem:[%s2095_s6 + $0xff0] sm:$0xff]  ;;  %v679_v14 = vld [vmem:[%s2095_s6 + $0xff8] sm:$0xff] }
 0x135   : > { %1673 = vst [vmem:[%s2128_s21 + $0xf00] sm:$0xff] %v1161_v19  ;;  %1674 = vst [vmem:[%s2128_s21 + $0xf08] sm:$0xff] %v1162_v20  ;;  %v1191_v15 = vmul.f32 %v2107_v6, %v678_v13  ;;  %v1192_v16 = vmul.f32 %v2107_v6, %v679_v14 }
 0x136   : > { %1675 = vst [vmem:[%s2128_s21 + $0xf10] sm:$0xff] %v1163_v21  ;;  %1676 = vst [vmem:[%s2128_s21 + $0xf18] sm:$0xff] %v1164_v25 }
 0x137   : > { %1677 = vst [vmem:[%s2128_s21 + $0xf20] sm:$0xff] %v1165_v26  ;;  %1678 = vst [vmem:[%s2128_s21 + $0xf28] sm:$0xff] %v1166_v27 }
 0x138   : > { %1679 = vst [vmem:[%s2128_s21 + $0xf30] sm:$0xff] %v1167_v31  ;;  %1680 = vst [vmem:[%s2128_s21 + $0xf38] sm:$0xff] %v1168_v32 }
 0x139   : > { %1681 = vst [vmem:[%s2128_s21 + $0xf40] sm:$0xff] %v1169_v33  ;;  %1682 = vst [vmem:[%s2128_s21 + $0xf48] sm:$0xff] %v1170_v37 }
 0x13a   : > { %1683 = vst [vmem:[%s2128_s21 + $0xf50] sm:$0xff] %v1171_v38  ;;  %1684 = vst [vmem:[%s2128_s21 + $0xf58] sm:$0xff] %v1172_v39 }
 0x13b   : > { %1685 = vst [vmem:[%s2128_s21 + $0xf60] sm:$0xff] %v1173_v43  ;;  %1686 = vst [vmem:[%s2128_s21 + $0xf68] sm:$0xff] %v1174_v44 }
 0x13c   : > { %1687 = vst [vmem:[%s2128_s21 + $0xf70] sm:$0xff] %v1175_v45  ;;  %1688 = vst [vmem:[%s2128_s21 + $0xf78] sm:$0xff] %v1176_v49 }
 0x13d   : > { %1689 = vst [vmem:[%s2128_s21 + $0xf80] sm:$0xff] %v1177_v50  ;;  %1690 = vst [vmem:[%s2128_s21 + $0xf88] sm:$0xff] %v1178_v51 }
 0x13e   : > { %1691 = vst [vmem:[%s2128_s21 + $0xf90] sm:$0xff] %v1179_v55  ;;  %1692 = vst [vmem:[%s2128_s21 + $0xf98] sm:$0xff] %v1180_v56 }
 0x13f   : > { %1693 = vst [vmem:[%s2128_s21 + $0xfa0] sm:$0xff] %v1181_v57  ;;  %1694 = vst [vmem:[%s2128_s21 + $0xfa8] sm:$0xff] %v1182_v61 }
 0x140   : > { %1695 = vst [vmem:[%s2128_s21 + $0xfb0] sm:$0xff] %v1183_v62  ;;  %1696 = vst [vmem:[%s2128_s21 + $0xfb8] sm:$0xff] %v1184_v63 }
 0x141   : > { %1697 = vst [vmem:[%s2128_s21 + $0xfc0] sm:$0xff] %v1185_v3  ;;  %1698 = vst [vmem:[%s2128_s21 + $0xfc8] sm:$0xff] %v1186_v4 }
 0x142   : > { %1699 = vst [vmem:[%s2128_s21 + $0xfd0] sm:$0xff] %v1187_v5  ;;  %1700 = vst [vmem:[%s2128_s21 + $0xfd8] sm:$0xff] %v1188_v10 }
 0x143   : > { %1701 = vst [vmem:[%s2128_s21 + $0xfe0] sm:$0xff] %v1189_v11  ;;  %1702 = vst [vmem:[%s2128_s21 + $0xfe8] sm:$0xff] %v1190_v12 }
 0x144   : > { %1703 = vst [vmem:[%s2128_s21 + $0xff0] sm:$0xff] %v1191_v15  ;;  %1704 = vst [vmem:[%s2128_s21 + $0xff8] sm:$0xff] %v1192_v16 }
 0x145   : > { %1906 = shalt.err (!%p1903_p2)
}
 0x146   : > { %s1907_s20 = scalar_lea.hbm %s3638_s8, 65536  ;;  %s1911_s26 = scalar_lea.hbm %s3696_s2, 131072 }
 0x147   : > { %p1908_p4 = scmp.ne.s32.totalorder %s3638_s8, %s1907_s20  ;;  %p1912_p9 = scmp.lt.u32.totalorder %s3638_s8, %s3696_s2 }
 0x148   : > { %p1913_p1 = scmp.lt.u32.totalorder %s1911_s26, %s1907_s20  ;;  %p1915_p6 = scmp.lt.u32.totalorder %s1907_s20, %s3638_s8 }
 0x149   : > { %p1909_p5 = pnand %p1908_p4, %p3703_p11 }
 0x14a   : > { %p1914_p3 = por %p1913_p1, %p1912_p9 }
 0x14b   : > { %p1910_p7 = pneg %p1909_p5 }
 0x14c   : > { %p1916_p12 = por %p1915_p6, %p1914_p3 }
 0x14e   : > { %p1917_p13 = pnand %p1916_p12, %p1910_p7 }
 0x150   : > { %1920 = shalt.err (!%p1917_p13)
}
 0x151   : > { %s1965_s6 = smov 1024   ;;  %s1966_s29 = smov 64  }
 0x152   : > { %1815 = dma.vmem_to_hbm [thread:$0]  (%p3703_p11), %s3640_s5, 65536, %s3638_s8, %s1706_s9, %s1965_s6, %s1965_s6, %s1966_s29  }
 0x153 PF: > { %s1735_s3 = sand.u32 1, %s1947_s11   ;;  %p3704_p8 = scmp.ne.s32.totalorder %s3701_s23, 0 }
 0x154   : > { %p3705_p10 = scmp.ge.s32.totalorder %s1959_s14, 2  ;;  %s1736_s21 = scalar_lea.sflag [#allocation5], %s1735_s3 }
 0x156   : > { %p1822_p0 = pnand %p3705_p10, %p3704_p8 }
 0x158   : > { %1942 = dma.done.wait (!%p1822_p0), %s1736_s21, 65536  }
 0x159   : > { %1944 = vsyncadd (!%p1822_p0), %s1736_s21, 4294901760  ;;  %p16_p2 = scmp.ge.s32.totalorder %s2010_s16, 4   ;;  %s3706_s11 = smov %s1951_s12 }
 0x15a   : > { %s3707_s12 = smov %s1955_s13  ;;  %s3708_s13 = smov %s2022_s19 }
 0x15b   : > { %s3709_s14 = smov %s2010_s16  ;;  %18 = sbr.rel (!%p16_p2) target bundleno = 7 (0x7), region = 73 }
 0x162   :  { %1741 = vsyncpa [#allocation4], 1 }
 0x163   :  { %1743 = vsyncpa [#allocation4 + $0x1], 1 }
 0x164   :  { %1744 = vsyncpa [#allocation5], 1 }
 0x165   :  { %1746 = vsyncpa [#allocation5 + $0x1], 1 }

</bundles_post_ra>
